<compile_context>
chip_gen: v7x
topology: tpu7x:2x2x1
jax: 0.10.0
libtpu: 0.0.40
codegen_flags: <defaults>
</compile_context>

<pallas_src>
import math
import jax
import jax.numpy as jnp
from jax.experimental import pallas as pl
from jax.experimental.pallas import tpu as pltpu


# ---------------------------------------------------------------------------
# Fused self-attention kernel: one batch element per grid step.
# ---------------------------------------------------------------------------
def _self_attn_kernel(x_ref, wq_ref, bq_ref, wk_ref, bk_ref, wv_ref, bv_ref,
                      gamma_ref, o_ref):
    # x_ref: (C, N)   wq/wk: (Cq, C)   wv: (C, C)   bq/bk: (Cq, 1)  bv: (C, 1)
    # gamma_ref: (1,) in SMEM          o_ref: (C, N)
    x = x_ref[...]                                                    # (C, N)

    # 1x1 convolutions == channel matmuls (MXU), biases broadcast along lanes.
    q = jnp.dot(wq_ref[...], x, preferred_element_type=jnp.float32) + bq_ref[...]
    k = jnp.dot(wk_ref[...], x, preferred_element_type=jnp.float32) + bk_ref[...]
    v = jnp.dot(wv_ref[...], x, preferred_element_type=jnp.float32) + bv_ref[...]

    # energy[i, j] = sum_c q[c, i] * k[c, j]  ->  (N, N)
    energy = jax.lax.dot_general(q, k, (((0,), (0,)), ((), ())),
                                 preferred_element_type=jnp.float32)

    # row-wise softmax over the last (lane) dim
    m = jnp.max(energy, axis=-1, keepdims=True)
    e = jnp.exp(energy - m)
    s = jnp.sum(e, axis=-1, keepdims=True)
    attn = e / s                                                      # (N, N)

    # out[c, i] = sum_j v[c, j] * attn[i, j]  ->  (C, N)
    out = jax.lax.dot_general(v, attn, (((1,), (1,)), ((), ())),
                              preferred_element_type=jnp.float32)

    o_ref[...] = (gamma_ref[0] * out + x).astype(o_ref.dtype)


# ---------------------------------------------------------------------------
# Wrapper
# ---------------------------------------------------------------------------
def self_attn_forward(x_nchw, params):
    """Self_Attn.forward: x (B, C, W, H) -> (B, C, W, H)."""
    wq, bq, wk, bk, wv, bv, gamma = params
    B, C, W, H = x_nchw.shape
    N = W * H
    Cq = wq.shape[0]

    xf = x_nchw.reshape(B, C, N)            # NCHW flat: C on sublanes, N on lanes
    bq2 = bq.reshape(Cq, 1)
    bk2 = bk.reshape(Cq, 1)
    bv2 = bv.reshape(C, 1)
    gamma1 = jnp.reshape(gamma, (1,)).astype(jnp.float32)

    cost = pl.CostEstimate(
        flops=int(B * (2 * N * C * (2 * Cq + C) + 2 * N * N * (Cq + C))),
        transcendentals=int(B * N * N),
        bytes_accessed=int(4 * (2 * B * C * N + 2 * Cq * C + C * C
                                + 2 * Cq + C + 1)),
    )

    out_flat = pl.pallas_call(
        _self_attn_kernel,
        out_shape=jax.ShapeDtypeStruct((B, C, N), x_nchw.dtype),
        grid=(B,),
        in_specs=[
            pl.BlockSpec((None, C, N), lambda b: (b, 0, 0)),    # x (per batch)
            pl.BlockSpec((Cq, C), lambda b: (0, 0)),            # Wq (resident)
            pl.BlockSpec((Cq, 1), lambda b: (0, 0)),            # bq
            pl.BlockSpec((Cq, C), lambda b: (0, 0)),            # Wk
            pl.BlockSpec((Cq, 1), lambda b: (0, 0)),            # bk
            pl.BlockSpec((C, C), lambda b: (0, 0)),             # Wv
            pl.BlockSpec((C, 1), lambda b: (0, 0)),             # bv
            pl.BlockSpec(memory_space=pltpu.MemorySpace.SMEM),  # gamma scalar
        ],
        out_specs=pl.BlockSpec((None, C, N), lambda b: (b, 0, 0)),
        compiler_params=pltpu.CompilerParams(dimension_semantics=("parallel",)),
        cost_estimate=cost,
    )(xf, wq, bq2, wk, bk2, wv, bv2, gamma1)

    return out_flat.reshape(B, C, W, H)


# ---------------------------------------------------------------------------
# Pure-JAX reference (for correctness check)
# ---------------------------------------------------------------------------
def ref_forward(x, params):
    wq, bq, wk, bk, wv, bv, gamma = params
    B, C, W, H = x.shape
    N = W * H
    hp = jax.lax.Precision.HIGHEST
    xf = x.reshape(B, C, N)
    q = jnp.einsum("oc,bcn->bon", wq, xf, precision=hp) + bq[None, :, None]
    k = jnp.einsum("oc,bcn->bon", wk, xf, precision=hp) + bk[None, :, None]
    v = jnp.einsum("oc,bcn->bon", wv, xf, precision=hp) + bv[None, :, None]
    energy = jnp.einsum("bci,bcj->bij", q, k, precision=hp)       # (B, N, N)
    attn = jax.nn.softmax(energy, axis=-1)
    out = jnp.einsum("bcj,bij->bci", v, attn, precision=hp)       # (B, C, N)
    out = gamma * out + xf
    return out.reshape(B, C, W, H)


if __name__ == "__main__":
    key = jax.random.PRNGKey(0)
    kx, kq, kk, kv, kb1, kb2, kb3 = jax.random.split(key, 7)

    B, C, W, H = 2, 32, 16, 16            # in_dim=32 -> query/key channels = 4
    Cq = C // 8
    x = jax.random.normal(kx, (B, C, W, H), jnp.float32)

    bound = 1.0 / math.sqrt(C)            # PyTorch Conv2d(kernel=1) init bound
    wq = jax.random.uniform(kq, (Cq, C), jnp.float32, -bound, bound)
    wk = jax.random.uniform(kk, (Cq, C), jnp.float32, -bound, bound)
    wv = jax.random.uniform(kv, (C, C), jnp.float32, -bound, bound)
    bq = jax.random.uniform(kb1, (Cq,), jnp.float32, -bound, bound)
    bk = jax.random.uniform(kb2, (Cq,), jnp.float32, -bound, bound)
    bv = jax.random.uniform(kb3, (C,), jnp.float32, -bound, bound)
    # PyTorch initializes gamma to 0 (which makes out == x trivially); use a
    # nonzero gamma so the attention path is actually exercised by the check.
    gamma = jnp.float32(0.5)

    params = (wq, bq, wk, bk, wv, bv, gamma)

    out = jax.block_until_ready(self_attn_forward(x, params))
    assert out.shape == (B, C, W, H), out.shape

    ref = jax.block_until_ready(ref_forward(x, params))
    err = jnp.max(jnp.abs(out - ref))
    assert jnp.allclose(out, ref, atol=1e-3, rtol=1e-3), f"max abs err {err}"

    print("KERNEL_OK")
</pallas_src>

<mosaic_0001>
module attributes {stable_mosaic.version = 11 : i64} {
  func.func @_self_attn_kernel(%arg0: i32, %arg1: memref<1x32x256xf32, #tpu.memory_space<vmem>>, %arg2: memref<4x32xf32, #tpu.memory_space<vmem>>, %arg3: memref<4x1xf32, #tpu.memory_space<vmem>>, %arg4: memref<4x32xf32, #tpu.memory_space<vmem>>, %arg5: memref<4x1xf32, #tpu.memory_space<vmem>>, %arg6: memref<32x32xf32, #tpu.memory_space<vmem>>, %arg7: memref<32x1xf32, #tpu.memory_space<vmem>>, %arg8: memref<1xf32, #tpu.memory_space<smem>>, %arg9: memref<1x32x256xf32, #tpu.memory_space<vmem>>) attributes {dimension_semantics = [#tpu.dimension_semantics<parallel>], iteration_bounds = array<i64: 2>, scalar_prefetch = 0 : i64, scratch_operands = 0 : i64, tpu.core_type = #tpu.core_type<tc>, window_params = [{transform_indices = @transform_0, window_bounds = array<i64: 1, 32, 256>}, {pipeline_mode = #tpu.pipeline_mode<synchronous>, transform_indices = @transform_1, window_bounds = array<i64: 4, 32>}, {pipeline_mode = #tpu.pipeline_mode<synchronous>, transform_indices = @transform_2, window_bounds = array<i64: 4, 1>}, {pipeline_mode = #tpu.pipeline_mode<synchronous>, transform_indices = @transform_3, window_bounds = array<i64: 4, 32>}, {pipeline_mode = #tpu.pipeline_mode<synchronous>, transform_indices = @transform_4, window_bounds = array<i64: 4, 1>}, {pipeline_mode = #tpu.pipeline_mode<synchronous>, transform_indices = @transform_5, window_bounds = array<i64: 32, 32>}, {pipeline_mode = #tpu.pipeline_mode<synchronous>, transform_indices = @transform_6, window_bounds = array<i64: 32, 1>}, {transform_indices = @transform_7, window_bounds = array<i64: 1>}, {transform_indices = @transform_8, window_bounds = array<i64: 1, 32, 256>}]} {
    %c0 = arith.constant 0 : index
    %c0_0 = arith.constant 0 : index
    %c0_1 = arith.constant 0 : index
    %0 = vector.load %arg1[%c0, %c0_0, %c0_1] : memref<1x32x256xf32, #tpu.memory_space<vmem>>, vector<1x32x256xf32>
    %1 = vector.shape_cast %0 : vector<1x32x256xf32> to vector<32x256xf32>
    %c0_2 = arith.constant 0 : index
    %c0_3 = arith.constant 0 : index
    %2 = vector.load %arg2[%c0_2, %c0_3] : memref<4x32xf32, #tpu.memory_space<vmem>>, vector<4x32xf32>
    %cst = arith.constant dense<0.000000e+00> : vector<4x256xf32>
    %3 = tpu.matmul %2, %1, %cst {dimension_numbers = #tpu.dot_dimension_numbers<[1], [0], [0], [1], [0, 0, 1, 1], [], []>} : vector<4x32xf32>, vector<32x256xf32>, vector<4x256xf32> -> vector<4x256xf32>
    %c0_4 = arith.constant 0 : index
    %c0_5 = arith.constant 0 : index
    %4 = vector.load %arg3[%c0_4, %c0_5] : memref<4x1xf32, #tpu.memory_space<vmem>>, vector<4x1xf32>
    %5 = vector.broadcast %4 : vector<4x1xf32> to vector<4x256xf32>
    %6 = arith.addf %3, %5 : vector<4x256xf32>
    %c0_6 = arith.constant 0 : index
    %c0_7 = arith.constant 0 : index
    %7 = vector.load %arg4[%c0_6, %c0_7] : memref<4x32xf32, #tpu.memory_space<vmem>>, vector<4x32xf32>
    %cst_8 = arith.constant dense<0.000000e+00> : vector<4x256xf32>
    %8 = tpu.matmul %7, %1, %cst_8 {dimension_numbers = #tpu.dot_dimension_numbers<[1], [0], [0], [1], [0, 0, 1, 1], [], []>} : vector<4x32xf32>, vector<32x256xf32>, vector<4x256xf32> -> vector<4x256xf32>
    %c0_9 = arith.constant 0 : index
    %c0_10 = arith.constant 0 : index
    %9 = vector.load %arg5[%c0_9, %c0_10] : memref<4x1xf32, #tpu.memory_space<vmem>>, vector<4x1xf32>
    %10 = vector.broadcast %9 : vector<4x1xf32> to vector<4x256xf32>
    %11 = arith.addf %8, %10 : vector<4x256xf32>
    %c0_11 = arith.constant 0 : index
    %c0_12 = arith.constant 0 : index
    %12 = vector.load %arg6[%c0_11, %c0_12] : memref<32x32xf32, #tpu.memory_space<vmem>>, vector<32x32xf32>
    %cst_13 = arith.constant dense<0.000000e+00> : vector<32x256xf32>
    %13 = tpu.matmul %12, %1, %cst_13 {dimension_numbers = #tpu.dot_dimension_numbers<[1], [0], [0], [1], [0, 0, 1, 1], [], []>} : vector<32x32xf32>, vector<32x256xf32>, vector<32x256xf32> -> vector<32x256xf32>
    %c0_14 = arith.constant 0 : index
    %c0_15 = arith.constant 0 : index
    %14 = vector.load %arg7[%c0_14, %c0_15] : memref<32x1xf32, #tpu.memory_space<vmem>>, vector<32x1xf32>
    %15 = vector.broadcast %14 : vector<32x1xf32> to vector<32x256xf32>
    %16 = arith.addf %13, %15 : vector<32x256xf32>
    %cst_16 = arith.constant dense<0.000000e+00> : vector<256x256xf32>
    %17 = tpu.matmul %6, %11, %cst_16 {dimension_numbers = #tpu.dot_dimension_numbers<[0], [0], [1], [1], [0, 1, 1, 1], [], []>} : vector<4x256xf32>, vector<4x256xf32>, vector<256x256xf32> -> vector<256x256xf32>
    %cst_17 = arith.constant dense<0xFF800000> : vector<256xf32>
    %18 = vector.multi_reduction <maximumf>, %17, %cst_17 [1] : vector<256x256xf32> to vector<256xf32>
    %19 = vector.shape_cast %18 : vector<256xf32> to vector<256x1xf32>
    %20 = vector.broadcast %19 : vector<256x1xf32> to vector<256x256xf32>
    %21 = arith.subf %17, %20 : vector<256x256xf32>
    %22 = math.exp %21 : vector<256x256xf32>
    %cst_18 = arith.constant dense<0.000000e+00> : vector<256xf32>
    %23 = vector.multi_reduction <add>, %22, %cst_18 [1] : vector<256x256xf32> to vector<256xf32>
    %24 = vector.shape_cast %23 : vector<256xf32> to vector<256x1xf32>
    %25 = vector.broadcast %24 : vector<256x1xf32> to vector<256x256xf32>
    %26 = arith.divf %22, %25 : vector<256x256xf32>
    %cst_19 = arith.constant dense<0.000000e+00> : vector<32x256xf32>
    %27 = tpu.matmul %16, %26, %cst_19 {dimension_numbers = #tpu.dot_dimension_numbers<[1], [1], [0], [0], [0, 0, 1, 0], [], []>} : vector<32x256xf32>, vector<256x256xf32>, vector<32x256xf32> -> vector<32x256xf32>
    %c0_20 = arith.constant 0 : index
    %28 = memref.load %arg8[%c0_20] : memref<1xf32, #tpu.memory_space<smem>>
    %29 = vector.broadcast %28 : f32 to vector<32x256xf32>
    %30 = arith.mulf %29, %27 : vector<32x256xf32>
    %31 = arith.addf %30, %1 : vector<32x256xf32>
    %c0_21 = arith.constant 0 : index
    %c0_22 = arith.constant 0 : index
    %c0_23 = arith.constant 0 : index
    %32 = vector.load %arg9[%c0_21, %c0_22, %c0_23] : memref<1x32x256xf32, #tpu.memory_space<vmem>>, vector<1x32x256xf32>
    %33 = vector.shape_cast %32 : vector<1x32x256xf32> to vector<32x256xf32>
    %34 = vector.shape_cast %31 : vector<32x256xf32> to vector<1x32x256xf32>
    tpu.vector_store %arg9[%c0_21, %c0_22, %c0_23], %34 {strides = array<i32>} : memref<1x32x256xf32, #tpu.memory_space<vmem>>, vector<1x32x256xf32>,
    return
  }
  func.func @transform_0(%arg0: i32) -> (i32, i32, i32) {
    %c0_i32 = arith.constant 0 : i32
    %c0_i32_0 = arith.constant 0 : i32
    %c0_i32_1 = arith.constant 0 : i32
    return %arg0, %c0_i32, %c0_i32_0 : i32, i32, i32
  }
  func.func @transform_1(%arg0: i32) -> (i32, i32) {
    %c0_i32 = arith.constant 0 : i32
    %c0_i32_0 = arith.constant 0 : i32
    %c0_i32_1 = arith.constant 0 : i32
    return %c0_i32, %c0_i32_0 : i32, i32
  }
  func.func @transform_2(%arg0: i32) -> (i32, i32) {
    %c0_i32 = arith.constant 0 : i32
    %c0_i32_0 = arith.constant 0 : i32
    %c0_i32_1 = arith.constant 0 : i32
    return %c0_i32, %c0_i32_0 : i32, i32
  }
  func.func @transform_3(%arg0: i32) -> (i32, i32) {
    %c0_i32 = arith.constant 0 : i32
    %c0_i32_0 = arith.constant 0 : i32
    %c0_i32_1 = arith.constant 0 : i32
    return %c0_i32, %c0_i32_0 : i32, i32
  }
  func.func @transform_4(%arg0: i32) -> (i32, i32) {
    %c0_i32 = arith.constant 0 : i32
    %c0_i32_0 = arith.constant 0 : i32
    %c0_i32_1 = arith.constant 0 : i32
    return %c0_i32, %c0_i32_0 : i32, i32
  }
  func.func @transform_5(%arg0: i32) -> (i32, i32) {
    %c0_i32 = arith.constant 0 : i32
    %c0_i32_0 = arith.constant 0 : i32
    %c0_i32_1 = arith.constant 0 : i32
    return %c0_i32, %c0_i32_0 : i32, i32
  }
  func.func @transform_6(%arg0: i32) -> (i32, i32) {
    %c0_i32 = arith.constant 0 : i32
    %c0_i32_0 = arith.constant 0 : i32
    %c0_i32_1 = arith.constant 0 : i32
    return %c0_i32, %c0_i32_0 : i32, i32
  }
  func.func @transform_7(%arg0: i32) -> i32 {
    %c0_i32 = arith.constant 0 : i32
    %c0_i32_0 = arith.constant 0 : i32
    return %c0_i32 : i32
  }
  func.func @transform_8(%arg0: i32) -> (i32, i32, i32) {
    %c0_i32 = arith.constant 0 : i32
    %c0_i32_0 = arith.constant 0 : i32
    %c0_i32_1 = arith.constant 0 : i32
    return %arg0, %c0_i32, %c0_i32_0 : i32, i32, i32
  }
}

</mosaic_0001>

<bundles_post_ra>
// kernel: tpu_custom_call.1
= control target key start
LH: loop header
LB: loop body
LE: loop exit
PB: predicated region body
PF: predicated region fallthrough
CT: control target
= control target key end

     0   :  { %s3133_s0 = inlined_call_operand.hbm [shape: f32[2,32,256], index: 0, kind: input, shape index: {}]   ;;  %s3134_s1 = inlined_call_operand.vmem [shape: f32[4,32], index: 1, kind: input, shape index: {}]   ;;  %s3135_s2 = inlined_call_operand.vmem [shape: f32[4,1], index: 2, kind: input, shape index: {}]   ;;  %s3136_s3 = inlined_call_operand.vmem [shape: f32[4,32], index: 3, kind: input, shape index: {}]   ;;  %s3137_s4 = inlined_call_operand.vmem [shape: f32[4,1], index: 4, kind: input, shape index: {}]   ;;  %s3138_s5 = inlined_call_operand.vmem [shape: f32[32,32], index: 5, kind: input, shape index: {}]   ;;  %s3139_s6 = inlined_call_operand.vmem [shape: f32[32,1], index: 6, kind: input, shape index: {}]   ;;  %s3140_s7 = inlined_call_operand.<no memory space> [shape: f32[1], index: 7, kind: input, shape index: {}]   ;;  %s3141_s8 = inlined_call_operand.hbm [shape: f32[2,32,256], index: 8, kind: output, shape index: {}]  }
   0x1   :  { %13 = sst [smem:[#allocation2]] %s3140_s7 }
   0x2   :  { %14 = vsyncpa [#allocation4], 0 }
   0x3   :  { %16 = vsyncpa [#allocation4 + $0x1], 0 }
   0x4   :  { %17 = vsyncpa [#allocation5], 0 }
   0x5   :  { %19 = vsyncpa [#allocation5 + $0x1], 0  ;;  %s2284_s29 = smov 0   ;;  %s2286_s30 = smov 0  }
   0x6   :  { %s2288_s9 = smov 0   ;;  %s2290_s10 = smov 0  }
   0x7 LB: > { %s2305_s7 = sadd.s32 4294967295, %s2226_s10   ;;  %s1732_s11 = sadd.s32 4294967294, %s2226_s10   ;;  %s2226_s10 = sphi %s2290_s10, %s3239_s10   ;;  %s2222_s9 = sphi %s2288_s9, %s3238_s9   ;;  %s2218_s30 = sphi %s2286_s30, %s3237_s30   ;;  %s2214_s29 = sphi %s2284_s29, %s3236_s29  }
   0x8   : > { %s2309_s12 = sadd.s32 1, %s2226_s10   ;;  %s32_s13 = sadd.s32 1, %s2222_s9 }
   0x9   : > { %s29_s14 = ssub.s32 %s2226_s10, %s2309_s12  ;;  %p39_p0 = scmp.ne.s32.totalorder %s2222_s9, %s2218_s30 }
   0xa   : > { %p30_p1 = scmp.eq.s32.totalorder %s29_s14, 0  ;;  %p40_p2 = scmp.eq.s32.totalorder %s2226_s10, 0 }
   0xb   : > { %p45_p3 = scmp.ne.s32.totalorder %s2218_s30, %s2214_s29  ;;  %p46_p4 = scmp.eq.s32.totalorder %s2305_s7, 0 }
   0xc   : > { %s2321_s15 = scalar_select %p30_p1, %s2222_s9, %s32_s13  }
   0xd   : > { %p2323_p5 = por %p40_p2, %p39_p0  ;;  %p2327_p6 = por %p46_p4, %p45_p3 }
   0xe   : > { %p216_p7 = scmp.eq.s32.totalorder %s2305_s7, 1  ;;  %p222_p8 = scmp.eq.s32.totalorder %s1732_s11, 1 }
   0xf   : > { %p1888_p10 = scmp.lt.s32.totalorder %s2226_s10, 2  ;;  %s263_s20 = sand.u32 1, %s2222_s9  }
  0x10   : > { %p2334_p11 = por %p216_p7, %p39_p0  ;;  %p2338_p12 = por %p222_p8, %p45_p3 }
  0x11   : > { %s1786_s21 = sshll.u32 %s2226_s10, 10  ;;  %s1735_s22 = sshll.u32 %s263_s20, 6 }
  0x12   : > { %s3173_s18 = scalar_select %p2334_p11, 1, 0 }
  0x13   : > { %s3174_s19 = scalar_select %p2338_p12, 1, 0 }
  0x14   : > { %s2347_s25 = scalar_lea.hbm %s3133_s0, %s1786_s21  ;;  %s267_s26 = scalar_lea.vmem [#allocation3], %s1735_s22 }
  0x15   : > { %s274_s27 = sshll.u32 %s267_s26, 4  ;;  %p2351_p13 = pnand %p1888_p10, %p2323_p5  ;;  %s2355_s27 = int_to_ptr.vmem [resolvable:$true] %s274_s27 }
  0x16   : > { %s2357_s11 = scalar_lea.sflag [#allocation4], %s263_s20  ;;  %s2130_s13 = scalar_lea.hbm %s2347_s25, 1024 }
  0x17   : > { %p2131_p0 = scmp.ne.s32.totalorder %s2347_s25, %s2130_s13  ;;  %p2132_p1 = pneg %p2351_p13 }
  0x18   : > { %s2135_s21 = scalar_lea.hbm %s3133_s0, 2048  ;;  %p2136_p4 = scmp.lt.u32.totalorder %s2347_s25, %s3133_s0 }
  0x19   : > { %p2133_p2 = pnand %p2132_p1, %p2131_p0  ;;  %p2137_p5 = scmp.lt.u32.totalorder %s2135_s21, %s2130_s13 }
  0x1a   : > { %p2139_p8 = scmp.lt.u32.totalorder %s2130_s13, %s2347_s25 }
  0x1b   : > { %p2134_p3 = pneg %p2133_p2  ;;  %p2138_p7 = por %p2137_p5, %p2136_p4 }
  0x1d   : > { %p2140_p10 = por %p2139_p8, %p2138_p7 }
  0x1f   : > { %p2141_p9 = pnand %p2140_p10, %p2134_p3 }
  0x21   : > { %2144 = shalt.err (!%p2141_p9)
}
  0x22   : > { %s2145_s20 = scalar_lea.vmem %s2355_s27, 1024  ;;  %s2228_s24 = smov [#allocation3]  }
  0x23   : > { %p2146_p0 = scmp.ne.s32.totalorder %s2355_s27, %s2145_s20  ;;  %s2150_s26 = sshll.u32 %s2228_s24, 4  ;;  %s2151_s26 = int_to_ptr.vmem [resolvable:$false] %s2150_s26 }
  0x24   : > { %s2152_s14 = scalar_lea.vmem %s2151_s26, 2048  ;;  %p2153_p11 = scmp.lt.s32.totalorder %s2355_s27, %s2151_s26 }
  0x25   : > { %p2148_p2 = pnand %p2146_p0, %p2132_p1  ;;  %p2154_p4 = scmp.lt.s32.totalorder %s2152_s14, %s2145_s20 }
  0x27   : > { %p2149_p12 = pneg %p2148_p2  ;;  %p2155_p5 = por %p2154_p4, %p2153_p11 }
  0x29   : > { %p2156_p7 = pnand %p2155_p5, %p2149_p12 }
  0x2b   : > { %2159 = shalt.err (!%p2156_p7)
}
  0x2c   : > { %s2229_s13 = smov 256   ;;  %s2230_s16 = smov 16  }
  0x2d   : > { %1883 = dma.hbm_to_vmem [thread:$0]  (!%p2351_p13), %s2347_s25, 1024, %s2355_s27, %s2357_s11, %s2229_s13, %s2229_s13, %s2230_s16  }
  0x2e   : > { %p1738_p9 = scmp.ge.s32.totalorder %s2226_s10, 1  ;;  %p282_p1 = scmp.lt.s32.totalorder %s2226_s10, 3 }
  0x30   : > { %p283_p3 = pnand %p1738_p9, %p282_p1 }
  0x32   : > { %286 = sbr.rel (%p283_p3) target bundleno = 1391 (0x56f), region = 52 }
  0x39   : > { %s2388_s21 = sand.u32 1, %s2218_s30  }
  0x3a   : > { %s1739_s22 = sshll.u32 %s2388_s21, 6  ;;  %s289_s23 = scalar_lea.sflag [#allocation4], %s2388_s21 }
  0x3b   : > { %s2394_s20 = scalar_lea.vmem [#allocation3], %s1739_s22 }
  0x3c   : > { %2205 = dma.done.wait (%p2327_p6), %s289_s23, 1024  }
  0x3d   : > { %2207 = vsyncadd (%p2327_p6), %s289_s23, 4294966272  ;;  %v3143_v0 = vmov 0.0   ;;  %v2232_v1 = vmov 0   ;;  %v326_v2 = vld [vmem:[%s2394_s20 + $0x8] sm:$0xff]  ;;  %v328_v3 = vld [vmem:[%s2394_s20 + $0x18] sm:$0xff]  ;;  %vm340_vm0 = vcmask 261120  }
  0x3e   : > { %408 = vmatprep.mubr.f32.mxu0 %v3143_v0  ;;  %1928 = vset.pattern.permute.xlu0 %v2232_v1  ;;  %v325_v4 = vld [vmem:[%s2394_s20] sm:$0xff]  ;;  %v1788_v5 = vpack.c.bf16 %v328_v3, %v326_v2  ;;  %v327_v6 = vld [vmem:[%s2394_s20 + $0x10] sm:$0xff]  ;;  %v330_v7 = vld [vmem:[%s2394_s20 + $0x28] sm:$0xff]  ;;  %vm786_vm1 = vcmask 1043456   ;;  %vm689_vm2 = vcmask 31744   ;;  %s1619_s27 = sld [smem:[#allocation2]] }
  0x3f   : > { %857 = vmatprep.mubr.f32.mxu1 %v3143_v0  ;;  %v332_v8 = vld [vmem:[%s2394_s20 + $0x38] sm:$0xff]  ;;  %v1790_v9 = vpack.c.bf16 %v327_v6, %v325_v4  ;;  %v329_v11 = vld [vmem:[%s2394_s20 + $0x20] sm:$0xff]  ;;  %v331_v12 = vld [vmem:[%s2394_s20 + $0x30] sm:$0xff]  ;;  %s3066_s28 = scalar_lea.vmem [#allocation6], %s1739_s22  ;;  %s1787_s11 = sshll.u32 %s2305_s7, 10 }
  0x40   : > { %v1792_v10 = vpack.c.bf16 %v332_v8, %v330_v7  ;;  %1789 = vmatprep.subr.bf16.mxu0 %v1788_v5  ;;  %v334_v13 = vld [vmem:[%s3135_s2] sm:$0xf]  ;;  %v1794_v14 = vpack.c.bf16 %v331_v12, %v329_v11  ;;  %s1659_s22 = sshll.u32 %s3066_s28, 4  ;;  %s3086_s14 = scalar_lea.hbm %s3141_s8, %s1787_s11  ;;  %s3079_s22 = int_to_ptr.vmem [resolvable:$true] %s1659_s22 }
  0x41   : > { %1791 = vmatpush1.bf16.msra.mxu0 %v1790_v9  ;;  %337 = vperm.xlu0 %1928, %v334_v13   ;;  %v416_v15 = vld [vmem:[%s3137_s4] sm:$0xf]  ;;  %s1646_s7 = scalar_lea.sflag [#allocation5], %s2388_s21  ;;  %s2160_s13 = scalar_lea.vmem %s3079_s22, 1024 }
  0x42   : > { %1793 = vmatprep.subr.bf16.mxu0 %v1792_v10  ;;  %v333_v16 = vld [vmem:[%s3134_s1] sm:$0xf]  ;;  %p2161_p6 = scmp.ne.s32.totalorder %s3079_s22, %s2160_s13  ;;  %p3233_p11 = scmp.ne.s32.totalorder %s3173_s18, 0 }
  0x43   : > { %v415_v17 = vld [vmem:[%s3136_s3] sm:$0xf]  ;;  %s2233_s16 = smov [#allocation6]  }
  0x44   : > { %p2162_p12 = pnand %p2161_p6, %p3233_p11  ;;  %s2164_s23 = sshll.u32 %s2233_s16, 4  ;;  %s2165_s23 = int_to_ptr.vmem [resolvable:$false] %s2164_s23 }
  0x45   : > { %1795 = vmatpush1.bf16.msra.mxu0 %v1794_v14  ;;  %419 = vperm.xlu0 %1928, %v416_v15   ;;  %s2166_s17 = scalar_lea.vmem %s2165_s23, 2048  ;;  %p2167_p8 = scmp.lt.s32.totalorder %s3079_s22, %s2165_s23 }
  0x46   : > { %1797 = vmatprep.subr.bf16.mxu0 %v1788_v5  ;;  %p2163_p13 = pneg %p2162_p12  ;;  %p2168_p10 = scmp.lt.s32.totalorder %s2166_s17, %s2160_s13 }
  0x48   : > { %1741 = vmatmul.mubr.msk.f32.vlgmr.msra.gmra.mrb[0].mxu0 %vm340_vm0, %v333_v16  ;;  %p2169_p0 = por %p2168_p10, %p2167_p8 }
  0x49   : > { %1799 = vmatpush1.bf16.msra.mxu0 %v1790_v9  ;;  %489 = vmatprep.mubr.f32.mxu0 %v3143_v0 }
  0x4a   : > { %1801 = vmatprep.subr.bf16.mxu0 %v1792_v10  ;;  %p2170_p2 = pnand %p2169_p0, %p2163_p13 }
  0x4d   : > { %1803 = vmatpush1.bf16.msra.mxu0 %v1794_v14 }
  0x4e   : > { %1805 = vmatprep.subr.bf16.mxu0 %v1788_v5 }
  0x50   : > { %1742 = vmatmul.mubr.msk.f32.vlgmr.msra.gmra.mrb[2].mxu0 %vm340_vm0, %v415_v17 }
  0x51   : > { %1807 = vmatpush1.bf16.msra.mxu0 %v1790_v9  ;;  %600 = vmatprep.mubr.f32.mxu0 %v3143_v0 }
  0x52   : > { %1809 = vmatprep.subr.bf16.mxu0 %v1792_v10 }
  0x55   : > { %1811 = vmatpush1.bf16.msra.mxu0 %v1794_v14 }
  0xc0   : > { %v338_v18 = vpop.permute.xlu0 %337 }
  0xc4   : > { %v420_v23 = vpop.permute.xlu0 %419 }
 0x11b   : > { %v410_v19 = vpop.f32.mrb[0].mxu0 }
 0x11c   : > { %v412_v20 = vpop.f32.mrb[1].mxu0  ;;  %v411_v21 = vadd.f32 %v410_v19, %v338_v18 }
 0x11d   : > { %v413_v27 = vadd.f32 %v412_v20, %v338_v18 }
 0x11e   : > { %625 = vxpose.xlu1.b32.start.end [1/1] (short) %v411_v21, 128 }
 0x123   : > { %v491_v22 = vpop.f32.mrb[2].mxu0 }
 0x124   : > { %v493_v24 = vpop.f32.mrb[3].mxu0  ;;  %v492_v26 = vadd.f32 %v491_v22, %v420_v23 }
 0x125   : > { %v494_v25 = vadd.f32 %v493_v24, %v420_v23 }
 0x127   : > { %1747 = vmatprep.subr.msk.mxu1 %vm786_vm1, %v494_v25 }
 0x128   : > { %1748 = vmatpush1.msk.msra.mxu1 %vm786_vm1, %v492_v26 }
 0x15b   : > { %657 = vxpose.xlu1.b32.start.end [1/1] (short) %v413_v27, 128 }
 0x179   : > { %1929 = vset.pattern.permute.xlu1 %v2232_v1 }
 0x19e   : > { %v641_v28 = vpop.trf.xlu1 }
 0x19f   : > { %1749 = vmatmul.mubr.msk.f32.vlgmr.msra.gmra.mrb[0].mxu1 %vm689_vm2, %v641_v28 }
 0x1a0   : > { %863 = vmatprep.mubr.f32.mxu1 %v3143_v0 }
 0x1a2   : > { %v642_v29 = vpop.trf.xlu1 }
 0x1a3   : > { %1750 = vmatmul.mubr.msk.f32.gmra.mrb[2].mxu1 %vm689_vm2, %v642_v29 }
 0x1a4   : > { %869 = vmatprep.mubr.f32.mxu1 %v3143_v0 }
 0x1a6   : > { %v643_v30 = vpop.trf.xlu1 }
 0x1a7   : > { %1751 = vmatmul.mubr.msk.f32.gmra.mrb[4].mxu1 %vm689_vm2, %v643_v30 }
 0x1a8   : > { %875 = vmatprep.mubr.f32.mxu1 %v3143_v0 }
 0x1aa   : > { %v644_v31 = vpop.trf.xlu1 }
 0x1ab   : > { %1752 = vmatmul.mubr.msk.f32.gmra.mrb[6].mxu1 %vm689_vm2, %v644_v31 }
 0x1ac   : > { %881 = vmatprep.mubr.f32.mxu1 %v3143_v0 }
 0x1ae   : > { %v645_v32 = vpop.trf.xlu1 }
 0x1af   : > { %1753 = vmatmul.mubr.msk.f32.gmra.mrb[8].mxu1 %vm689_vm2, %v645_v32 }
 0x1b0   : > { %887 = vmatprep.mubr.f32.mxu1 %v3143_v0 }
 0x1b2   : > { %v646_v33 = vpop.trf.xlu1 }
 0x1b3   : > { %1754 = vmatmul.mubr.msk.f32.gmra.mrb[10].mxu1 %vm689_vm2, %v646_v33 }
 0x1b4   : > { %893 = vmatprep.mubr.f32.mxu1 %v3143_v0 }
 0x1b6   : > { %v647_v34 = vpop.trf.xlu1 }
 0x1b7   : > { %1755 = vmatmul.mubr.msk.f32.gmra.mrb[12].mxu1 %vm689_vm2, %v647_v34 }
 0x1b8   : > { %899 = vmatprep.mubr.f32.mxu1 %v3143_v0 }
 0x1ba   : > { %v648_v35 = vpop.trf.xlu1 }
 0x1bb   : > { %1756 = vmatmul.mubr.msk.f32.gmra.mrb[14].mxu1 %vm689_vm2, %v648_v35 }
 0x1bc   : > { %905 = vmatprep.mubr.f32.mxu1 %v3143_v0 }
 0x1be   : > { %v649_v36 = vpop.trf.xlu1 }
 0x1bf   : > { %1757 = vmatmul.mubr.msk.f32.gmra.mrb[16].mxu1 %vm689_vm2, %v649_v36 }
 0x1c0   : > { %911 = vmatprep.mubr.f32.mxu1 %v3143_v0 }
 0x1c2   : > { %v650_v37 = vpop.trf.xlu1 }
 0x1c3   : > { %1758 = vmatmul.mubr.msk.f32.gmra.mrb[18].mxu1 %vm689_vm2, %v650_v37 }
 0x1c4   : > { %917 = vmatprep.mubr.f32.mxu1 %v3143_v0 }
 0x1c6   : > { %v651_v38 = vpop.trf.xlu1 }
 0x1c7   : > { %1759 = vmatmul.mubr.msk.f32.gmra.mrb[20].mxu1 %vm689_vm2, %v651_v38 }
 0x1c8   : > { %923 = vmatprep.mubr.f32.mxu1 %v3143_v0 }
 0x1ca   : > { %v652_v39 = vpop.trf.xlu1 }
 0x1cb   : > { %1760 = vmatmul.mubr.msk.f32.gmra.mrb[22].mxu1 %vm689_vm2, %v652_v39 }
 0x1cc   : > { %929 = vmatprep.mubr.f32.mxu1 %v3143_v0 }
 0x1ce   : > { %v653_v40 = vpop.trf.xlu1 }
 0x1cf   : > { %1761 = vmatmul.mubr.msk.f32.gmra.mrb[24].mxu1 %vm689_vm2, %v653_v40 }
 0x1d0   : > { %935 = vmatprep.mubr.f32.mxu1 %v3143_v0 }
 0x1d2   : > { %v654_v41 = vpop.trf.xlu1 }
 0x1d3   : > { %1762 = vmatmul.mubr.msk.f32.gmra.mrb[26].mxu1 %vm689_vm2, %v654_v41 }
 0x1d4   : > { %941 = vmatprep.mubr.f32.mxu1 %v3143_v0 }
 0x1d6   : > { %v655_v42 = vpop.trf.xlu1 }
 0x1d7   : > { %1763 = vmatmul.mubr.msk.f32.gmra.mrb[28].mxu1 %vm689_vm2, %v655_v42 }
 0x1d8   : > { %947 = vmatprep.mubr.f32.mxu1 %v3143_v0 }
 0x1da   : > { %v656_v43 = vpop.trf.xlu1 }
 0x1db   : > { %1764 = vmatmul.mubr.msk.f32.gmra.mrb[30].mxu1 %vm689_vm2, %v656_v43 }
 0x1dc   : > { %953 = vmatprep.mubr.f32.mxu1 %v3143_v0 }
 0x1de   : > { %v673_v44 = vpop.trf.xlu1 }
 0x1df   : > { %1765 = vmatmul.mubr.msk.f32.gmra.mrb[32].mxu1 %vm689_vm2, %v673_v44 }
 0x1e0   : > { %959 = vmatprep.mubr.f32.mxu1 %v3143_v0 }
 0x1e2   : > { %v674_v45 = vpop.trf.xlu1 }
 0x1e3   : > { %1766 = vmatmul.mubr.msk.f32.gmra.mrb[34].mxu1 %vm689_vm2, %v674_v45 }
 0x1e4   : > { %965 = vmatprep.mubr.f32.mxu1 %v3143_v0 }
 0x1e6   : > { %v675_v46 = vpop.trf.xlu1 }
 0x1e7   : > { %1767 = vmatmul.mubr.msk.f32.gmra.mrb[36].mxu1 %vm689_vm2, %v675_v46 }
 0x1e8   : > { %971 = vmatprep.mubr.f32.mxu1 %v3143_v0 }
 0x1ea   : > { %v676_v47 = vpop.trf.xlu1 }
 0x1eb   : > { %1768 = vmatmul.mubr.msk.f32.gmra.mrb[38].mxu1 %vm689_vm2, %v676_v47 }
 0x1ec   : > { %977 = vmatprep.mubr.f32.mxu1 %v3143_v0 }
 0x1ee   : > { %v677_v48 = vpop.trf.xlu1 }
 0x1ef   : > { %1769 = vmatmul.mubr.msk.f32.gmra.mrb[40].mxu1 %vm689_vm2, %v677_v48 }
 0x1f0   : > { %983 = vmatprep.mubr.f32.mxu1 %v3143_v0 }
 0x1f2   : > { %v678_v49 = vpop.trf.xlu1 }
 0x1f3   : > { %1770 = vmatmul.mubr.msk.f32.gmra.mrb[42].mxu1 %vm689_vm2, %v678_v49 }
 0x1f4   : > { %989 = vmatprep.mubr.f32.mxu1 %v3143_v0 }
 0x1f6   : > { %v679_v50 = vpop.trf.xlu1 }
 0x1f7   : > { %1771 = vmatmul.mubr.msk.f32.gmra.mrb[44].mxu1 %vm689_vm2, %v679_v50 }
 0x1f8   : > { %995 = vmatprep.mubr.f32.mxu1 %v3143_v0 }
 0x1fa   : > { %v680_v51 = vpop.trf.xlu1 }
 0x1fb   : > { %1772 = vmatmul.mubr.msk.f32.gmra.mrb[46].mxu1 %vm689_vm2, %v680_v51 }
 0x1fc   : > { %1001 = vmatprep.mubr.f32.mxu1 %v3143_v0 }
 0x1fe   : > { %v681_v52 = vpop.trf.xlu1 }
 0x1ff   : > { %1773 = vmatmul.mubr.msk.f32.gmra.mrb[48].mxu1 %vm689_vm2, %v681_v52 }
 0x200   : > { %1007 = vmatprep.mubr.f32.mxu1 %v3143_v0 }
 0x202   : > { %v682_v53 = vpop.trf.xlu1 }
 0x203   : > { %1774 = vmatmul.mubr.msk.f32.gmra.mrb[50].mxu1 %vm689_vm2, %v682_v53 }
 0x204   : > { %1013 = vmatprep.mubr.f32.mxu1 %v3143_v0 }
 0x206   : > { %v683_v54 = vpop.trf.xlu1 }
 0x207   : > { %1775 = vmatmul.mubr.msk.f32.gmra.mrb[52].mxu1 %vm689_vm2, %v683_v54 }
 0x208   : > { %1019 = vmatprep.mubr.f32.mxu1 %v3143_v0 }
 0x20a   : > { %v684_v55 = vpop.trf.xlu1 }
 0x20b   : > { %1776 = vmatmul.mubr.msk.f32.gmra.mrb[54].mxu1 %vm689_vm2, %v684_v55 }
 0x20c   : > { %1025 = vmatprep.mubr.f32.mxu1 %v3143_v0 }
 0x20e   : > { %v685_v56 = vpop.trf.xlu1 }
 0x20f   : > { %1777 = vmatmul.mubr.msk.f32.gmra.mrb[56].mxu1 %vm689_vm2, %v685_v56 }
 0x210   : > { %1031 = vmatprep.mubr.f32.mxu1 %v3143_v0 }
 0x212   : > { %v686_v57 = vpop.trf.xlu1 }
 0x213   : > { %1778 = vmatmul.mubr.msk.f32.gmra.mrb[58].mxu1 %vm689_vm2, %v686_v57 }
 0x214   : > { %1037 = vmatprep.mubr.f32.mxu1 %v3143_v0 }
 0x216   : > { %v687_v58 = vpop.trf.xlu1 }
 0x217   : > { %1779 = vmatmul.mubr.msk.f32.gmra.mrb[60].mxu1 %vm689_vm2, %v687_v58 }
 0x218   : > { %1043 = vmatprep.mubr.f32.mxu1 %v3143_v0 }
 0x21a   : > { %v688_v59 = vpop.trf.xlu1 }
 0x21b   : > { %1780 = vmatmul.mubr.msk.f32.gmra.mrb[62].mxu1 %vm689_vm2, %v688_v59 }
 0x272   : > { %v2489_v60 = vpop.f32.mrb[0].mxu1 }
 0x273   : > { %v2491_v61 = vpop.f32.mrb[1].mxu1 }
 0x274   : > { %v1050_v62 = vmax.f32 %v2489_v60, %v2491_v61 }
 0x276   : > { %1051 = vmax.xlane.f32.xlu0 %v1050_v62  ;;  %v2495_v63 = vpop.f32.mrb[2].mxu1 }
 0x277   : > { %v2497_v1 = vpop.f32.mrb[3].mxu1 }
 0x278   : > { %v1053_v2 = vmax.f32 %v2495_v63, %v2497_v1 }
 0x27a   : > { %1054 = vmax.xlane.f32.xlu0 %v1053_v2  ;;  %v2501_v3 = vpop.f32.mrb[4].mxu1 }
 0x27b   : > { %v2503_v4 = vpop.f32.mrb[5].mxu1 }
 0x27c   : > { %v1056_v5 = vmax.f32 %v2501_v3, %v2503_v4 }
 0x27e   : > { %1057 = vmax.xlane.f32.xlu0 %v1056_v5  ;;  %v2507_v6 = vpop.f32.mrb[6].mxu1 }
 0x27f   : > { %v2509_v7 = vpop.f32.mrb[7].mxu1 }
 0x280   : > { %v1059_v8 = vmax.f32 %v2507_v6, %v2509_v7 }
 0x282   : > { %1060 = vmax.xlane.f32.xlu0 %v1059_v8  ;;  %v2513_v9 = vpop.f32.mrb[8].mxu1 }
 0x283   : > { %v2515_v10 = vpop.f32.mrb[9].mxu1 }
 0x284   : > { %v1062_v11 = vmax.f32 %v2513_v9, %v2515_v10 }
 0x286   : > { %1063 = vmax.xlane.f32.xlu0 %v1062_v11  ;;  %v2519_v12 = vpop.f32.mrb[10].mxu1 }
 0x287   : > { %v2521_v13 = vpop.f32.mrb[11].mxu1 }
 0x288   : > { %v1065_v14 = vmax.f32 %v2519_v12, %v2521_v13 }
 0x28a   : > { %1066 = vmax.xlane.f32.xlu0 %v1065_v14  ;;  %v2525_v15 = vpop.f32.mrb[12].mxu1 }
 0x28b   : > { %v2527_v16 = vpop.f32.mrb[13].mxu1 }
 0x28c   : > { %v1068_v17 = vmax.f32 %v2525_v15, %v2527_v16 }
 0x28e   : > { %1069 = vmax.xlane.f32.xlu0 %v1068_v17  ;;  %v2531_v18 = vpop.f32.mrb[14].mxu1 }
 0x28f   : > { %v2533_v19 = vpop.f32.mrb[15].mxu1 }
 0x290   : > { %v1071_v20 = vmax.f32 %v2531_v18, %v2533_v19 }
 0x292   : > { %1072 = vmax.xlane.f32.xlu0 %v1071_v20  ;;  %v2537_v21 = vpop.f32.mrb[16].mxu1 }
 0x293   : > { %v2539_v22 = vpop.f32.mrb[17].mxu1 }
 0x294   : > { %v1074_v23 = vmax.f32 %v2537_v21, %v2539_v22 }
 0x296   : > { %1075 = vmax.xlane.f32.xlu1 %v1074_v23  ;;  %v2543_v24 = vpop.f32.mrb[18].mxu1 }
 0x297   : > { %v2545_v25 = vpop.f32.mrb[19].mxu1 }
 0x298   : > { %v1077_v26 = vmax.f32 %v2543_v24, %v2545_v25 }
 0x29a   : > { %1078 = vmax.xlane.f32.xlu0 %v1077_v26  ;;  %v2549_v27 = vpop.f32.mrb[20].mxu1 }
 0x29b   : > { %v2551_v28 = vpop.f32.mrb[21].mxu1 }
 0x29c   : > { %v1080_v29 = vmax.f32 %v2549_v27, %v2551_v28 }
 0x29e   : > { %1081 = vmax.xlane.f32.xlu0 %v1080_v29  ;;  %v2555_v30 = vpop.f32.mrb[22].mxu1 }
 0x29f   : > { %v2557_v31 = vpop.f32.mrb[23].mxu1 }
 0x2a0   : > { %v1083_v32 = vmax.f32 %v2555_v30, %v2557_v31 }
 0x2a2   : > { %1084 = vmax.xlane.f32.xlu0 %v1083_v32  ;;  %v2561_v33 = vpop.f32.mrb[24].mxu1 }
 0x2a3   : > { %v2563_v34 = vpop.f32.mrb[25].mxu1 }
 0x2a4   : > { %v1086_v35 = vmax.f32 %v2561_v33, %v2563_v34 }
 0x2a6   : > { %1087 = vmax.xlane.f32.xlu0 %v1086_v35  ;;  %v2567_v36 = vpop.f32.mrb[26].mxu1 }
 0x2a7   : > { %v2569_v37 = vpop.f32.mrb[27].mxu1 }
 0x2a8   : > { %v1089_v38 = vmax.f32 %v2567_v36, %v2569_v37 }
 0x2aa   : > { %1090 = vmax.xlane.f32.xlu0 %v1089_v38  ;;  %v2573_v39 = vpop.f32.mrb[28].mxu1 }
 0x2ab   : > { %v2575_v40 = vpop.f32.mrb[29].mxu1 }
 0x2ac   : > { %v1092_v41 = vmax.f32 %v2573_v39, %v2575_v40 }
 0x2ae   : > { %1093 = vmax.xlane.f32.xlu0 %v1092_v41  ;;  %v2579_v42 = vpop.f32.mrb[30].mxu1 }
 0x2af   : > { %v2581_v43 = vpop.f32.mrb[31].mxu1 }
 0x2b0   : > { %v1095_v44 = vmax.f32 %v2579_v42, %v2581_v43 }
 0x2b2   : > { %1096 = vmax.xlane.f32.xlu0 %v1095_v44  ;;  %v2585_v45 = vpop.f32.mrb[32].mxu1 }
 0x2b3   : > { %v2587_v46 = vpop.f32.mrb[33].mxu1 }
 0x2b4   : > { %v1098_v47 = vmax.f32 %v2585_v45, %v2587_v46 }
 0x2b6   : > { %1099 = vmax.xlane.f32.xlu0 %v1098_v47  ;;  %v2591_v48 = vpop.f32.mrb[34].mxu1 }
 0x2b7   : > { %v2593_v49 = vpop.f32.mrb[35].mxu1 }
 0x2b8   : > { %v1101_v50 = vmax.f32 %v2591_v48, %v2593_v49 }
 0x2ba   : > { %1102 = vmax.xlane.f32.xlu0 %v1101_v50  ;;  %v2597_v51 = vpop.f32.mrb[36].mxu1  ;;  %v496_v50 = vld [vmem:[%s3138_s5] sm:$0xff] }
 0x2bb   : > { %v2599_v52 = vpop.f32.mrb[37].mxu1  ;;  %1743 = vmatmul.mubr.msk.f32.vlgmr.msra.gmra.mrb[4].mxu0 %vm340_vm0, %v496_v50 }
 0x2bc   : > { %v1104_v53 = vmax.f32 %v2597_v51, %v2599_v52  ;;  %606 = vmatprep.mubr.f32.mxu0 %v3143_v0 }
 0x2be   : > { %1105 = vmax.xlane.f32.xlu0 %v1104_v53  ;;  %v2603_v54 = vpop.f32.mrb[38].mxu1 }
 0x2bf   : > { %v2605_v55 = vpop.f32.mrb[39].mxu1 }
 0x2c0   : > { %v1107_v56 = vmax.f32 %v2603_v54, %v2605_v55 }
 0x2c2   : > { %1108 = vmax.xlane.f32.xlu0 %v1107_v56  ;;  %v2609_v57 = vpop.f32.mrb[40].mxu1 }
 0x2c3   : > { %v2611_v58 = vpop.f32.mrb[41].mxu1 }
 0x2c4   : > { %v1110_v59 = vmax.f32 %v2609_v57, %v2611_v58 }
 0x2c6   : > { %1111 = vmax.xlane.f32.xlu0 %v1110_v59  ;;  %v2615_v62 = vpop.f32.mrb[42].mxu1 }
 0x2c7   : > { %v2617_v2 = vpop.f32.mrb[43].mxu1 }
 0x2c8   : > { %v1113_v5 = vmax.f32 %v2615_v62, %v2617_v2 }
 0x2ca   : > { %1114 = vmax.xlane.f32.xlu0 %v1113_v5  ;;  %v2621_v8 = vpop.f32.mrb[44].mxu1 }
 0x2cb   : > { %v2623_v11 = vpop.f32.mrb[45].mxu1 }
 0x2cc   : > { %v1116_v14 = vmax.f32 %v2621_v8, %v2623_v11 }
 0x2ce   : > { %1117 = vmax.xlane.f32.xlu0 %v1116_v14  ;;  %v2627_v17 = vpop.f32.mrb[46].mxu1 }
 0x2cf   : > { %v2629_v20 = vpop.f32.mrb[47].mxu1 }
 0x2d0   : > { %3176 = vst [vmem:[#allocation9_spill] sm:$0xff] %v2629_v20  ;;  %v1119_v23 = vmax.f32 %v2627_v17, %v2629_v20 }
 0x2d2   : > { %1120 = vmax.xlane.f32.xlu0 %v1119_v23  ;;  %v2633_v26 = vpop.f32.mrb[48].mxu1 }
 0x2d3   : > { %3177 = vst [vmem:[#allocation10_spill] sm:$0xff] %v2633_v26  ;;  %v2635_v29 = vpop.f32.mrb[49].mxu1 }
 0x2d4   : > { %3178 = vst [vmem:[#allocation11_spill] sm:$0xff] %v2635_v29  ;;  %v1122_v32 = vmax.f32 %v2633_v26, %v2635_v29 }
 0x2d6   : > { %1123 = vmax.xlane.f32.xlu0 %v1122_v32  ;;  %v2639_v35 = vpop.f32.mrb[50].mxu1 }
 0x2d7   : > { %3179 = vst [vmem:[#allocation12_spill] sm:$0xff] %v2639_v35  ;;  %v2641_v38 = vpop.f32.mrb[51].mxu1 }
 0x2d8   : > { %3180 = vst [vmem:[#allocation13_spill] sm:$0xff] %v2641_v38  ;;  %v1125_v41 = vmax.f32 %v2639_v35, %v2641_v38 }
 0x2da   : > { %1126 = vmax.xlane.f32.xlu0 %v1125_v41  ;;  %v2645_v44 = vpop.f32.mrb[52].mxu1 }
 0x2db   : > { %3181 = vst [vmem:[#allocation14_spill] sm:$0xff] %v2645_v44  ;;  %v2647_v47 = vpop.f32.mrb[53].mxu1 }
 0x2dc   : > { %3182 = vst [vmem:[#allocation15_spill] sm:$0xff] %v2647_v47  ;;  %v1128_v53 = vmax.f32 %v2645_v44, %v2647_v47 }
 0x2de   : > { %1129 = vmax.xlane.f32.xlu0 %v1128_v53  ;;  %v2656_v56 = vpop.f32.mrb[54].mxu1  ;;  %v3189_v53 = vmov 0.0  }
 0x2df   : > { %3183 = vst [vmem:[#allocation16_spill] sm:$0xff] %v2656_v56  ;;  %v2658_v59 = vpop.f32.mrb[55].mxu1 }
 0x2e0   : > { %3184 = vst [vmem:[#allocation17_spill] sm:$0xff] %v2658_v59  ;;  %v1131_v5 = vmax.f32 %v2656_v56, %v2658_v59 }
 0x2e2   : > { %1132 = vmax.xlane.f32.xlu0 %v1131_v5  ;;  %v2662_v14 = vpop.f32.mrb[56].mxu1 }
 0x2e3   : > { %3185 = vst [vmem:[#allocation18_spill] sm:$0xff] %v2662_v14  ;;  %v2664_v23 = vpop.f32.mrb[57].mxu1 }
 0x2e4   : > { %3186 = vst [vmem:[#allocation19_spill] sm:$0xff] %v2664_v23  ;;  %v1134_v32 = vmax.f32 %v2662_v14, %v2664_v23  ;;  %v497_v23 = vld [vmem:[%s3138_s5 + $0x8] sm:$0xff] }
 0x2e5   : > { %1744 = vmatmul.mubr.msk.f32.gmra.mrb[6].mxu0 %vm340_vm0, %v497_v23 }
 0x2e6   : > { %1135 = vmax.xlane.f32.xlu1 %v1134_v32  ;;  %v2668_v41 = vpop.f32.mrb[58].mxu1  ;;  %612 = vmatprep.mubr.f32.mxu0 %v3189_v53 }
 0x2e7   : > { %v2670_v50 = vpop.f32.mrb[59].mxu1 }
 0x2ea   : > { %v2674_v0 = vpop.f32.mrb[60].mxu1 }
 0x2eb   : > { %3187 = vst [vmem:[#allocation20_spill] sm:$0xff] %v2674_v0  ;;  %v2676_v47 = vpop.f32.mrb[61].mxu1 }
 0x2ec   : > { %3188 = vst [vmem:[#allocation21_spill] sm:$0xff] %v2676_v47  ;;  %v1140_v5 = vmax.f32 %v2674_v0, %v2676_v47  ;;  %v498_v47 = vld [vmem:[%s3138_s5 + $0x10] sm:$0xff] }
 0x2ed   : > { %1745 = vmatmul.mubr.msk.f32.gmra.mrb[8].mxu0 %vm340_vm0, %v498_v47 }
 0x2ee   : > { %1141 = vmax.xlane.f32.xlu1 %v1140_v5  ;;  %v2680_v59 = vpop.f32.mrb[62].mxu1  ;;  %618 = vmatprep.mubr.f32.mxu0 %v3189_v53  ;;  %v499_v5 = vld [vmem:[%s3138_s5 + $0x18] sm:$0xff] }
 0x2ef   : > { %v2682_v56 = vpop.f32.mrb[63].mxu1 }
 0x2f1   : > { %1746 = vmatmul.mubr.msk.f32.gmra.mrb[10].mxu0 %vm340_vm0, %v499_v5 }
 0x303   : > { %v1052_v32 = vpop.xlane.xlu0 %1051 }
 0x304   : > { %v1146_v0 = vsub.f32 %v2489_v60, %v1052_v32  ;;  %v1147_v23 = vsub.f32 %v2491_v61, %v1052_v32 }
 0x306   : > { %v1210_v14 = vmul.f32 1.442695, %v1146_v0  ;;  %v1212_v44 = vmul.f32 1.442695, %v1147_v23 }
 0x307   : > { %v1055_v38 = vpop.xlane.xlu0 %1054 }
 0x308   : > { %1930 = vpow2.f32 %v1210_v14  ;;  %v1148_v35 = vsub.f32 %v2495_v63, %v1055_v38  ;;  %v1149_v47 = vsub.f32 %v2497_v1, %v1055_v38 }
 0x309   : > { %1932 = vpow2.f32 %v1212_v44 }
 0x30a   : > { %v1214_v53 = vmul.f32 1.442695, %v1148_v35  ;;  %v1216_v29 = vmul.f32 1.442695, %v1149_v47 }
 0x30b   : > { %v1058_v26 = vpop.xlane.xlu0 %1057 }
 0x30c   : > { %1934 = vpow2.f32 %v1214_v53  ;;  %v1150_v5 = vsub.f32 %v2501_v3, %v1058_v26  ;;  %v1151_v20 = vsub.f32 %v2503_v4, %v1058_v26 }
 0x30d   : > { %1936 = vpow2.f32 %v1216_v29 }
 0x30e   : > { %v1218_v60 = vmul.f32 1.442695, %v1150_v5  ;;  %v1220_v61 = vmul.f32 1.442695, %v1151_v20 }
 0x30f   : > { %v1061_v0 = vpop.xlane.xlu0 %1060 }
 0x310   : > { %1938 = vpow2.f32 %v1218_v60  ;;  %v1152_v14 = vsub.f32 %v2507_v6, %v1061_v0  ;;  %v1153_v63 = vsub.f32 %v2509_v7, %v1061_v0 }
 0x311   : > { %1940 = vpow2.f32 %v1220_v61 }
 0x312   : > { %v2708_v1 = vpop.eup %1930  ;;  %v1222_v35 = vmul.f32 1.442695, %v1152_v14  ;;  %v1224_v38 = vmul.f32 1.442695, %v1153_v63 }
 0x313   : > { %v2710_v44 = vpop.eup %1932  ;;  %v1064_v32 = vpop.xlane.xlu0 %1063 }
 0x314   : > { %1942 = vpow2.f32 %v1222_v35  ;;  %v1154_v3 = vsub.f32 %v2513_v9, %v1064_v32  ;;  %v1155_v4 = vsub.f32 %v2515_v10, %v1064_v32  ;;  %v1338_v20 = vadd.f32 %v2710_v44, %v2708_v1 }
 0x315   : > { %1944 = vpow2.f32 %v1224_v38 }
 0x316   : > { %v2716_v6 = vpop.eup %1934  ;;  %v1226_v7 = vmul.f32 1.442695, %v1154_v3  ;;  %v1228_v26 = vmul.f32 1.442695, %v1155_v4  ;;  %1339 = vadd.xlane.f32.xlu0 %v1338_v20 }
 0x317   : > { %v2718_v29 = vpop.eup %1936  ;;  %v1067_v23 = vpop.xlane.xlu0 %1066 }
 0x318   : > { %1946 = vpow2.f32 %v1226_v7  ;;  %v1156_v47 = vsub.f32 %v2519_v12, %v1067_v23  ;;  %v1157_v53 = vsub.f32 %v2521_v13, %v1067_v23  ;;  %v1341_v9 = vadd.f32 %v2718_v29, %v2716_v6 }
 0x319   : > { %1948 = vpow2.f32 %v1228_v26 }
 0x31a   : > { %v2724_v10 = vpop.eup %1938  ;;  %v1230_v5 = vmul.f32 1.442695, %v1156_v47  ;;  %v1232_v60 = vmul.f32 1.442695, %v1157_v53  ;;  %1342 = vadd.xlane.f32.xlu0 %v1341_v9 }
 0x31b   : > { %v2726_v61 = vpop.eup %1940  ;;  %v1070_v0 = vpop.xlane.xlu0 %1069 }
 0x31c   : > { %1950 = vpow2.f32 %v1230_v5  ;;  %v1158_v14 = vsub.f32 %v2525_v15, %v1070_v0  ;;  %v1159_v63 = vsub.f32 %v2527_v16, %v1070_v0  ;;  %v1344_v12 = vadd.f32 %v2726_v61, %v2724_v10 }
 0x31d   : > { %1952 = vpow2.f32 %v1232_v60 }
 0x31e   : > { %v2732_v13 = vpop.eup %1942  ;;  %v1234_v35 = vmul.f32 1.442695, %v1158_v14  ;;  %v1236_v38 = vmul.f32 1.442695, %v1159_v63  ;;  %1345 = vadd.xlane.f32.xlu0 %v1344_v12 }
 0x31f   : > { %v2734_v32 = vpop.eup %1944  ;;  %v1073_v3 = vpop.xlane.xlu0 %1072 }
 0x320   : > { %1954 = vpow2.f32 %v1234_v35  ;;  %v1160_v4 = vsub.f32 %v2531_v18, %v1073_v3  ;;  %v1161_v20 = vsub.f32 %v2533_v19, %v1073_v3  ;;  %v1347_v15 = vadd.f32 %v2734_v32, %v2732_v13 }
 0x321   : > { %1956 = vpow2.f32 %v1236_v38 }
 0x322   : > { %v2740_v16 = vpop.eup %1946  ;;  %v1238_v7 = vmul.f32 1.442695, %v1160_v4  ;;  %v1240_v26 = vmul.f32 1.442695, %v1161_v20  ;;  %1348 = vadd.xlane.f32.xlu0 %v1347_v15 }
 0x323   : > { %v2742_v23 = vpop.eup %1948  ;;  %v1076_v47 = vpop.xlane.xlu1 %1075 }
 0x324   : > { %1958 = vpow2.f32 %v1238_v7  ;;  %v1162_v53 = vsub.f32 %v2537_v21, %v1076_v47  ;;  %v1163_v9 = vsub.f32 %v2539_v22, %v1076_v47  ;;  %v1350_v18 = vadd.f32 %v2742_v23, %v2740_v16 }
 0x325   : > { %1960 = vpow2.f32 %v1240_v26  ;;  %v3190_v47 = vmax.f32 %v2668_v41, %v2670_v50 }
 0x326   : > { %v2748_v19 = vpop.eup %1950  ;;  %v1242_v5 = vmul.f32 1.442695, %v1162_v53  ;;  %v1244_v60 = vmul.f32 1.442695, %v1163_v9  ;;  %1351 = vadd.xlane.f32.xlu0 %v1350_v18 }
 0x327   : > { %v2750_v0 = vpop.eup %1952  ;;  %v1079_v14 = vpop.xlane.xlu0 %1078 }
 0x328   : > { %1962 = vpow2.f32 %v1242_v5  ;;  %v1164_v63 = vsub.f32 %v2543_v24, %v1079_v14  ;;  %v1165_v12 = vsub.f32 %v2545_v25, %v1079_v14  ;;  %v1353_v21 = vadd.f32 %v2750_v0, %v2748_v19 }
 0x329   : > { %1964 = vpow2.f32 %v1244_v60 }
 0x32a   : > { %v2756_v22 = vpop.eup %1954  ;;  %v1246_v35 = vmul.f32 1.442695, %v1164_v63  ;;  %v1248_v38 = vmul.f32 1.442695, %v1165_v12  ;;  %1354 = vadd.xlane.f32.xlu0 %v1353_v21 }
 0x32b   : > { %v2758_v3 = vpop.eup %1956  ;;  %v1082_v4 = vpop.xlane.xlu0 %1081 }
 0x32c   : > { %1966 = vpow2.f32 %v1246_v35  ;;  %v1166_v20 = vsub.f32 %v2549_v27, %v1082_v4  ;;  %v1167_v15 = vsub.f32 %v2551_v28, %v1082_v4  ;;  %v1356_v24 = vadd.f32 %v2758_v3, %v2756_v22 }
 0x32d   : > { %1968 = vpow2.f32 %v1248_v38 }
 0x32e   : > { %v2764_v25 = vpop.eup %1958  ;;  %v1250_v7 = vmul.f32 1.442695, %v1166_v20  ;;  %v1252_v26 = vmul.f32 1.442695, %v1167_v15  ;;  %1138 = vmax.xlane.f32.xlu0 %v3190_v47  ;;  %1357 = vadd.xlane.f32.xlu1 %v1356_v24  ;;  %v3191_v20 = vmax.f32 %v2680_v59, %v2682_v56 }
 0x32f   : > { %v2769_v53 = vpop.eup %1960  ;;  %v1085_v9 = vpop.xlane.xlu0 %1084 }
 0x330   : > { %1970 = vpow2.f32 %v1250_v7  ;;  %v1168_v27 = vsub.f32 %v2555_v30, %v1085_v9  ;;  %v1169_v28 = vsub.f32 %v2557_v31, %v1085_v9  ;;  %v1359_v18 = vadd.f32 %v2769_v53, %v2764_v25 }
 0x331   : > { %1972 = vpow2.f32 %v1252_v26 }
 0x332   : > { %v2775_v5 = vpop.eup %1962  ;;  %v1254_v60 = vmul.f32 1.442695, %v1168_v27  ;;  %v1256_v14 = vmul.f32 1.442695, %v1169_v28  ;;  %1360 = vadd.xlane.f32.xlu0 %v1359_v18 }
 0x333   : > { %v2777_v63 = vpop.eup %1964  ;;  %v1088_v12 = vpop.xlane.xlu0 %1087 }
 0x334   : > { %1974 = vpow2.f32 %v1254_v60  ;;  %v1170_v21 = vsub.f32 %v2561_v33, %v1088_v12  ;;  %v1171_v35 = vsub.f32 %v2563_v34, %v1088_v12  ;;  %v1362_v30 = vadd.f32 %v2777_v63, %v2775_v5 }
 0x335   : > { %1976 = vpow2.f32 %v1256_v14 }
 0x336   : > { %v2783_v31 = vpop.eup %1966  ;;  %v1258_v38 = vmul.f32 1.442695, %v1170_v21  ;;  %v1260_v4 = vmul.f32 1.442695, %v1171_v35  ;;  %1144 = vmax.xlane.f32.xlu0 %v3191_v20  ;;  %1363 = vadd.xlane.f32.xlu1 %v1362_v30 }
 0x337   : > { %v2788_v15 = vpop.eup %1968  ;;  %v1091_v24 = vpop.xlane.xlu0 %1090 }
 0x338   : > { %1978 = vpow2.f32 %v1258_v38  ;;  %v1172_v33 = vsub.f32 %v2567_v36, %v1091_v24  ;;  %v1173_v34 = vsub.f32 %v2569_v37, %v1091_v24  ;;  %v1365_v7 = vadd.f32 %v2788_v15, %v2783_v31 }
 0x339   : > { %1980 = vpow2.f32 %v1260_v4 }
 0x33a   : > { %v2794_v26 = vpop.eup %1970  ;;  %v1262_v47 = vmul.f32 1.442695, %v1172_v33  ;;  %v1264_v9 = vmul.f32 1.442695, %v1173_v34  ;;  %1366 = vadd.xlane.f32.xlu0 %v1365_v7 }
 0x33b   : > { %v2796_v27 = vpop.eup %1972  ;;  %v1094_v28 = vpop.xlane.xlu0 %1093 }
 0x33c   : > { %1982 = vpow2.f32 %v1262_v47  ;;  %v1174_v18 = vsub.f32 %v2573_v39, %v1094_v28  ;;  %v1175_v60 = vsub.f32 %v2575_v40, %v1094_v28  ;;  %v1368_v36 = vadd.f32 %v2796_v27, %v2794_v26 }
 0x33d   : > { %1984 = vpow2.f32 %v1264_v9 }
 0x33e   : > { %v2802_v37 = vpop.eup %1974  ;;  %v1266_v14 = vmul.f32 1.442695, %v1174_v18  ;;  %v1268_v12 = vmul.f32 1.442695, %v1175_v60  ;;  %1369 = vadd.xlane.f32.xlu1 %v1368_v36 }
 0x33f   : > { %v2804_v21 = vpop.eup %1976  ;;  %v1097_v35 = vpop.xlane.xlu0 %1096 }
 0x340   : > { %1986 = vpow2.f32 %v1266_v14  ;;  %v1176_v30 = vsub.f32 %v2579_v42, %v1097_v35  ;;  %v1177_v38 = vsub.f32 %v2581_v43, %v1097_v35  ;;  %v1371_v39 = vadd.f32 %v2804_v21, %v2802_v37 }
 0x341   : > { %1988 = vpow2.f32 %v1268_v12 }
 0x342   : > { %v2810_v40 = vpop.eup %1978  ;;  %v1270_v4 = vmul.f32 1.442695, %v1176_v30  ;;  %v1272_v20 = vmul.f32 1.442695, %v1177_v38  ;;  %1372 = vadd.xlane.f32.xlu0 %v1371_v39 }
 0x343   : > { %v2812_v24 = vpop.eup %1980  ;;  %v1100_v33 = vpop.xlane.xlu0 %1099 }
 0x344   : > { %1990 = vpow2.f32 %v1270_v4  ;;  %v1178_v34 = vsub.f32 %v2585_v45, %v1100_v33  ;;  %v1179_v7 = vsub.f32 %v2587_v46, %v1100_v33  ;;  %v1374_v42 = vadd.f32 %v2812_v24, %v2810_v40 }
 0x345   : > { %1992 = vpow2.f32 %v1272_v20 }
 0x346   : > { %v2818_v43 = vpop.eup %1982  ;;  %v1274_v47 = vmul.f32 1.442695, %v1178_v34  ;;  %v1276_v9 = vmul.f32 1.442695, %v1179_v7  ;;  %1375 = vadd.xlane.f32.xlu1 %v1374_v42 }
 0x347   : > { %v2820_v28 = vpop.eup %1984  ;;  %v1103_v18 = vpop.xlane.xlu0 %1102 }
 0x348   : > { %1994 = vpow2.f32 %v1274_v47  ;;  %v1180_v60 = vsub.f32 %v2591_v48, %v1103_v18  ;;  %v1181_v36 = vsub.f32 %v2593_v49, %v1103_v18  ;;  %v1377_v45 = vadd.f32 %v2820_v28, %v2818_v43 }
 0x349   : > { %1996 = vpow2.f32 %v1276_v9 }
 0x34a   : > { %v2826_v46 = vpop.eup %1986  ;;  %v1278_v14 = vmul.f32 1.442695, %v1180_v60  ;;  %v1280_v12 = vmul.f32 1.442695, %v1181_v36  ;;  %1378 = vadd.xlane.f32.xlu0 %v1377_v45 }
 0x34b   : > { %v2828_v35 = vpop.eup %1988  ;;  %v1106_v30 = vpop.xlane.xlu0 %1105 }
 0x34c   : > { %1998 = vpow2.f32 %v1278_v14  ;;  %v1182_v38 = vsub.f32 %v2597_v51, %v1106_v30  ;;  %v1183_v39 = vsub.f32 %v2599_v52, %v1106_v30  ;;  %v1380_v48 = vadd.f32 %v2828_v35, %v2826_v46 }
 0x34d   : > { %2000 = vpow2.f32 %v1280_v12 }
 0x34e   : > { %v2834_v49 = vpop.eup %1990  ;;  %v1282_v4 = vmul.f32 1.442695, %v1182_v38  ;;  %v1284_v20 = vmul.f32 1.442695, %v1183_v39  ;;  %1381 = vadd.xlane.f32.xlu1 %v1380_v48 }
 0x34f   : > { %v2836_v33 = vpop.eup %1992  ;;  %v1109_v34 = vpop.xlane.xlu0 %1108 }
 0x350   : > { %2002 = vpow2.f32 %v1282_v4  ;;  %v1184_v7 = vsub.f32 %v2603_v54, %v1109_v34  ;;  %v1185_v42 = vsub.f32 %v2605_v55, %v1109_v34  ;;  %v1383_v51 = vadd.f32 %v2836_v33, %v2834_v49 }
 0x351   : > { %2004 = vpow2.f32 %v1284_v20 }
 0x352   : > { %v2842_v52 = vpop.eup %1994  ;;  %v1286_v47 = vmul.f32 1.442695, %v1184_v7  ;;  %v1288_v9 = vmul.f32 1.442695, %v1185_v42  ;;  %1384 = vadd.xlane.f32.xlu0 %v1383_v51 }
 0x353   : > { %v2844_v18 = vpop.eup %1996  ;;  %v1112_v60 = vpop.xlane.xlu0 %1111 }
 0x354   : > { %2006 = vpow2.f32 %v1286_v47  ;;  %v1186_v36 = vsub.f32 %v2609_v57, %v1112_v60  ;;  %v1187_v45 = vsub.f32 %v2611_v58, %v1112_v60  ;;  %v1386_v54 = vadd.f32 %v2844_v18, %v2842_v52 }
 0x355   : > { %2008 = vpow2.f32 %v1288_v9 }
 0x356   : > { %v2850_v55 = vpop.eup %1998  ;;  %v1290_v14 = vmul.f32 1.442695, %v1186_v36  ;;  %v1292_v12 = vmul.f32 1.442695, %v1187_v45  ;;  %1387 = vadd.xlane.f32.xlu1 %v1386_v54  ;;  %v3192_v54 = vld [vmem:[#allocation9_spill] sm:$0xff] }
 0x357   : > { %v2852_v30 = vpop.eup %2000  ;;  %v1115_v38 = vpop.xlane.xlu0 %1114 }
 0x358   : > { %2010 = vpow2.f32 %v1290_v14  ;;  %v1188_v39 = vsub.f32 %v2615_v62, %v1115_v38  ;;  %v1189_v48 = vsub.f32 %v2617_v2, %v1115_v38  ;;  %v1389_v57 = vadd.f32 %v2852_v30, %v2850_v55 }
 0x359   : > { %2012 = vpow2.f32 %v1292_v12 }
 0x35a   : > { %v2858_v58 = vpop.eup %2002  ;;  %v1294_v4 = vmul.f32 1.442695, %v1188_v39  ;;  %v1296_v20 = vmul.f32 1.442695, %v1189_v48  ;;  %1390 = vadd.xlane.f32.xlu0 %v1389_v57  ;;  %v3194_v57 = vld [vmem:[#allocation10_spill] sm:$0xff] }
 0x35b   : > { %v2860_v34 = vpop.eup %2004  ;;  %v1118_v7 = vpop.xlane.xlu0 %1117 }
 0x35c   : > { %2014 = vpow2.f32 %v1294_v4  ;;  %v1190_v42 = vsub.f32 %v2621_v8, %v1118_v7  ;;  %v1191_v51 = vsub.f32 %v2623_v11, %v1118_v7  ;;  %v1392_v62 = vadd.f32 %v2860_v34, %v2858_v58 }
 0x35d   : > { %2016 = vpow2.f32 %v1296_v20  ;;  %v3195_v20 = vld [vmem:[#allocation11_spill] sm:$0xff] }
 0x35e   : > { %v2866_v2 = vpop.eup %2006  ;;  %v1298_v47 = vmul.f32 1.442695, %v1190_v42  ;;  %v1300_v9 = vmul.f32 1.442695, %v1191_v51  ;;  %1393 = vadd.xlane.f32.xlu1 %v1392_v62 }
 0x35f   : > { %v2868_v60 = vpop.eup %2008  ;;  %v1121_v36 = vpop.xlane.xlu0 %1120 }
 0x360   : > { %2018 = vpow2.f32 %v1298_v47  ;;  %v1192_v45 = vsub.f32 %v2627_v17, %v1121_v36  ;;  %v1193_v14 = vsub.f32 %v3192_v54, %v1121_v36  ;;  %v1395_v8 = vadd.f32 %v2868_v60, %v2866_v2  ;;  %v3197_v36 = vld [vmem:[#allocation12_spill] sm:$0xff]  ;;  %v3198_v54 = vld [vmem:[#allocation13_spill] sm:$0xff] }
 0x361   : > { %2020 = vpow2.f32 %v1300_v9 }
 0x362   : > { %v2874_v11 = vpop.eup %2010  ;;  %v1302_v12 = vmul.f32 1.442695, %v1192_v45  ;;  %v1304_v38 = vmul.f32 1.442695, %v1193_v14  ;;  %1396 = vadd.xlane.f32.xlu0 %v1395_v8 }
 0x363   : > { %3193 = vst [vmem:[#allocation9_spill] sm:$0xff] %v2874_v11  ;;  %v2876_v39 = vpop.eup %2012  ;;  %v1124_v48 = vpop.xlane.xlu0 %1123 }
 0x364   : > { %2022 = vpow2.f32 %v1302_v12  ;;  %v1194_v4 = vsub.f32 %v3194_v57, %v1124_v48  ;;  %v1195_v7 = vsub.f32 %v3195_v20, %v1124_v48  ;;  %v1398_v17 = vadd.f32 %v2876_v39, %v2874_v11  ;;  %v3201_v20 = vld [vmem:[#allocation14_spill] sm:$0xff] }
 0x365   : > { %2024 = vpow2.f32 %v1304_v38 }
 0x366   : > { %v2882_v42 = vpop.eup %2014  ;;  %v1306_v51 = vmul.f32 1.442695, %v1194_v4  ;;  %v1308_v62 = vmul.f32 1.442695, %v1195_v7  ;;  %1399 = vadd.xlane.f32.xlu1 %v1398_v17  ;;  %v3202_v17 = vld [vmem:[#allocation15_spill] sm:$0xff] }
 0x367   : > { %3196 = vst [vmem:[#allocation10_spill] sm:$0xff] %v2882_v42  ;;  %v2884_v47 = vpop.eup %2016  ;;  %v1127_v9 = vpop.xlane.xlu0 %1126 }
 0x368   : > { %2026 = vpow2.f32 %v1306_v51  ;;  %v1196_v45 = vsub.f32 %v3197_v36, %v1127_v9  ;;  %v1197_v14 = vsub.f32 %v3198_v54, %v1127_v9  ;;  %v1401_v8 = vadd.f32 %v2884_v47, %v2882_v42 }
 0x369   : > { %2028 = vpow2.f32 %v1308_v62 }
 0x36a   : > { %v2890_v12 = vpop.eup %2018  ;;  %v1310_v38 = vmul.f32 1.442695, %v1196_v45  ;;  %v1312_v48 = vmul.f32 1.442695, %v1197_v14  ;;  %1402 = vadd.xlane.f32.xlu0 %v1401_v8  ;;  %v3203_v8 = vld [vmem:[#allocation16_spill] sm:$0xff] }
 0x36b   : > { %3199 = vst [vmem:[#allocation11_spill] sm:$0xff] %v2890_v12  ;;  %v2892_v57 = vpop.eup %2020  ;;  %v1130_v4 = vpop.xlane.xlu0 %1129 }
 0x36c   : > { %3200 = vst [vmem:[#allocation12_spill] sm:$0xff] %v2892_v57  ;;  %2030 = vpow2.f32 %v1310_v38  ;;  %v1198_v7 = vsub.f32 %v3201_v20, %v1130_v4  ;;  %v1199_v51 = vsub.f32 %v3202_v17, %v1130_v4  ;;  %v1404_v9 = vadd.f32 %v2892_v57, %v2890_v12  ;;  %v3204_v38 = vld [vmem:[#allocation17_spill] sm:$0xff] }
 0x36d   : > { %2032 = vpow2.f32 %v1312_v48 }
 0x36e   : > { %v2898_v36 = vpop.eup %2022  ;;  %v1314_v62 = vmul.f32 1.442695, %v1198_v7  ;;  %v1316_v54 = vmul.f32 1.442695, %v1199_v51  ;;  %1405 = vadd.xlane.f32.xlu1 %v1404_v9  ;;  %v3206_v9 = vld [vmem:[#allocation18_spill] sm:$0xff] }
 0x36f   : > { %v2900_v45 = vpop.eup %2024  ;;  %v1133_v14 = vpop.xlane.xlu0 %1132 }
 0x370   : > { %2034 = vpow2.f32 %v1314_v62  ;;  %v1200_v11 = vsub.f32 %v3203_v8, %v1133_v14  ;;  %v1201_v42 = vsub.f32 %v3204_v38, %v1133_v14  ;;  %v1407_v4 = vadd.f32 %v2900_v45, %v2898_v36  ;;  %v3207_v62 = vld [vmem:[#allocation19_spill] sm:$0xff] }
 0x371   : > { %2036 = vpow2.f32 %v1316_v54 }
 0x372   : > { %v2906_v20 = vpop.eup %2026  ;;  %v1318_v48 = vmul.f32 1.442695, %v1200_v11  ;;  %v1320_v17 = vmul.f32 1.442695, %v1201_v42  ;;  %1408 = vadd.xlane.f32.xlu0 %v1407_v4 }
 0x373   : > { %3205 = vst [vmem:[#allocation13_spill] sm:$0xff] %v2906_v20  ;;  %v2908_v7 = vpop.eup %2028  ;;  %v1136_v51 = vpop.xlane.xlu1 %1135 }
 0x374   : > { %2038 = vpow2.f32 %v1318_v48  ;;  %v1202_v12 = vsub.f32 %v3206_v9, %v1136_v51  ;;  %v1203_v57 = vsub.f32 %v3207_v62, %v1136_v51  ;;  %v1410_v14 = vadd.f32 %v2908_v7, %v2906_v20 }
 0x375   : > { %2040 = vpow2.f32 %v1320_v17 }
 0x376   : > { %v2914_v8 = vpop.eup %2030  ;;  %v1322_v54 = vmul.f32 1.442695, %v1202_v12  ;;  %v1324_v38 = vmul.f32 1.442695, %v1203_v57  ;;  %1411 = vadd.xlane.f32.xlu1 %v1410_v14 }
 0x377   : > { %3208 = vst [vmem:[#allocation14_spill] sm:$0xff] %v2914_v8  ;;  %v2916_v11 = vpop.eup %2032 }
 0x378   : > { %3209 = vst [vmem:[#allocation15_spill] sm:$0xff] %v2916_v11  ;;  %2042 = vpow2.f32 %v1322_v54  ;;  %v1413_v42 = vadd.f32 %v2916_v11, %v2914_v8  ;;  %v500_v54 = vld [vmem:[%s3139_s6] sm:$0xff] }
 0x379   : > { %2044 = vpow2.f32 %v1324_v38 }
 0x37a   : > { %v2920_v4 = vpop.eup %2034  ;;  %1414 = vadd.xlane.f32.xlu0 %v1413_v42  ;;  %v3216_v42 = vld [vmem:[#allocation20_spill] sm:$0xff] }
 0x37b   : > { %3210 = vst [vmem:[#allocation16_spill] sm:$0xff] %v2920_v4  ;;  %v2922_v48 = vpop.eup %2036  ;;  %v1142_v38 = vpop.xlane.xlu1 %1141 }
 0x37c   : > { %3211 = vst [vmem:[#allocation17_spill] sm:$0xff] %v2922_v48  ;;  %v1416_v17 = vadd.f32 %v2922_v48, %v2920_v4  ;;  %v3217_v48 = vld [vmem:[#allocation21_spill] sm:$0xff] }
 0x37e   : > { %v2926_v51 = vpop.eup %2038  ;;  %1417 = vadd.xlane.f32.xlu1 %v1416_v17  ;;  %v1206_v17 = vsub.f32 %v3216_v42, %v1142_v38 }
 0x37f   : > { %3212 = vst [vmem:[#allocation18_spill] sm:$0xff] %v2926_v51  ;;  %v2928_v12 = vpop.eup %2040 }
 0x380   : > { %3213 = vst [vmem:[#allocation19_spill] sm:$0xff] %v2928_v12  ;;  %v1419_v57 = vadd.f32 %v2928_v12, %v2926_v51  ;;  %v1207_v51 = vsub.f32 %v3217_v48, %v1142_v38  ;;  %v1330_v12 = vmul.f32 1.442695, %v1206_v17 }
 0x382   : > { %v2932_v9 = vpop.eup %2042  ;;  %1420 = vadd.xlane.f32.xlu0 %v1419_v57  ;;  %v1332_v20 = vmul.f32 1.442695, %v1207_v51 }
 0x383   : > { %3214 = vst [vmem:[#allocation22_spill] sm:$0xff] %v2932_v9  ;;  %v2934_v62 = vpop.eup %2044 }
 0x384   : > { %3215 = vst [vmem:[#allocation23_spill] sm:$0xff] %v2934_v62  ;;  %v1422_v14 = vadd.f32 %v2934_v62, %v2932_v9 }
 0x386   : > { %1423 = vadd.xlane.f32.xlu1 %v1422_v14 }
 0x38e   : > { %v2943_v9 = vpop.f32.mrb[4].mxu0 }
 0x397   : > { %506 = vperm.xlu1 %1929, %v500_v54   ;;  %v2945_v54 = vpop.f32.mrb[5].mxu0 }
 0x398   : > { %3218 = vst [vmem:[#allocation20_spill] sm:$0xff] %v2945_v54 }
 0x3a3   : > { %v1340_v4 = vpop.xlane.xlu0 %1339 }
 0x3a4   : > { %2046 = vrcp.f32 %v1340_v4 }
 0x3a7   : > { %v1343_v57 = vpop.xlane.xlu0 %1342 }
 0x3a8   : > { %2048 = vrcp.f32 %v1343_v57 }
 0x3a9   : > { %2050 = vpow2.f32 %v1330_v12 }
 0x3aa   : > { %2052 = vpow2.f32 %v1332_v20 }
 0x3ab   : > { %v1346_v8 = vpop.xlane.xlu0 %1345 }
 0x3ac   : > { %2054 = vrcp.f32 %v1346_v8 }
 0x3ae   : > { %v2047_v62 = vpop.eup %2046 }
 0x3af   : > { %v1349_v14 = vpop.xlane.xlu0 %1348  ;;  %v1436_v48 = vmul.f32 %v2047_v62, %v2710_v44  ;;  %v1435_v51 = vmul.f32 %v2047_v62, %v2708_v1 }
 0x3b0   : > { %2056 = vrcp.f32 %v1349_v14 }
 0x3b2   : > { %v2049_v42 = vpop.eup %2048 }
 0x3b3   : > { %v1352_v11 = vpop.xlane.xlu0 %1351  ;;  %v1439_v4 = vmul.f32 %v2049_v42, %v2718_v29  ;;  %v1438_v12 = vmul.f32 %v2049_v42, %v2716_v6  ;;  %v2951_v38 = vpop.eup %2050 }
 0x3b4   : > { %v2953_v17 = vpop.eup %2052  ;;  %2058 = vrcp.f32 %v1352_v11 }
 0x3b5   : > { %v1812_v20 = vpack.c.bf16 %v1439_v4, %v1436_v48  ;;  %v1814_v8 = vpack.c.bf16 %v1438_v12, %v1435_v51  ;;  %v1428_v44 = vadd.f32 %v2953_v17, %v2951_v38 }
 0x3b6   : > { %v2055_v14 = vpop.eup %2054 }
 0x3b7   : > { %1813 = vmatprep.subr.bf16.mxu1 %v1812_v20  ;;  %v1355_v57 = vpop.xlane.xlu0 %1354  ;;  %v1442_v1 = vmul.f32 %v2055_v14, %v2726_v61  ;;  %v1441_v62 = vmul.f32 %v2055_v14, %v2724_v10 }
 0x3b8   : > { %2060 = vrcp.f32 %v1355_v57  ;;  %1815 = vmatpush1.bf16.xpose.msra.mxu1 %v1814_v8 }
 0x3ba   : > { %v2057_v29 = vpop.eup %2056 }
 0x3bb   : > { %v1139_v54 = vpop.xlane.xlu0 %1138  ;;  %1429 = vadd.xlane.f32.xlu1 %v1428_v44  ;;  %v1445_v6 = vmul.f32 %v2057_v29, %v2734_v32  ;;  %v1444_v42 = vmul.f32 %v2057_v29, %v2732_v13  ;;  %v1358_v4 = vpop.xlane.xlu1 %1357 }
 0x3bc   : > { %v1204_v11 = vsub.f32 %v2668_v41, %v1139_v54  ;;  %v1205_v48 = vsub.f32 %v2670_v50, %v1139_v54  ;;  %2062 = vrcp.f32 %v1358_v4 }
 0x3bd   : > { %v1816_v51 = vpack.c.bf16 %v1445_v6, %v1442_v1  ;;  %v1818_v12 = vpack.c.bf16 %v1444_v42, %v1441_v62 }
 0x3be   : > { %v1326_v20 = vmul.f32 1.442695, %v1204_v11  ;;  %v1328_v8 = vmul.f32 1.442695, %v1205_v48  ;;  %v2059_v44 = vpop.eup %2058 }
 0x3bf   : > { %1817 = vmatprep.subr.bf16.mxu1 %v1816_v51  ;;  %v1361_v57 = vpop.xlane.xlu0 %1360  ;;  %v1448_v13 = vmul.f32 %v2059_v44, %v2742_v23  ;;  %v1447_v50 = vmul.f32 %v2059_v44, %v2740_v16  ;;  %v502_v16 = vld [vmem:[%s3139_s6 + $0x10] sm:$0xff]  ;;  %v503_v44 = vld [vmem:[%s3139_s6 + $0x18] sm:$0xff] }
 0x3c0   : > { %2064 = vpow2.f32 %v1326_v20  ;;  %1819 = vmatpush1.bf16.xpose.msra.mxu1 %v1818_v12 }
 0x3c1   : > { %2066 = vpow2.f32 %v1328_v8 }
 0x3c2   : > { %v2061_v61 = vpop.eup %2060  ;;  %2068 = vrcp.f32 %v1361_v57 }
 0x3c3   : > { %v1145_v10 = vpop.xlane.xlu0 %1144  ;;  %v1451_v41 = vmul.f32 %v2061_v61, %v2750_v0  ;;  %v1450_v32 = vmul.f32 %v2061_v61, %v2748_v19  ;;  %v1364_v29 = vpop.xlane.xlu1 %1363 }
 0x3c4   : > { %v1208_v54 = vsub.f32 %v2680_v59, %v1145_v10  ;;  %v1209_v14 = vsub.f32 %v2682_v56, %v1145_v10  ;;  %2070 = vrcp.f32 %v1364_v29  ;;  %v2972_v19 = vpop.f32.mrb[6].mxu0 }
 0x3c5   : > { %v1820_v1 = vpack.c.bf16 %v1451_v41, %v1448_v13  ;;  %v1822_v6 = vpack.c.bf16 %v1450_v32, %v1447_v50  ;;  %v2976_v56 = vpop.f32.mrb[7].mxu0 }
 0x3c6   : > { %v1334_v62 = vmul.f32 1.442695, %v1208_v54  ;;  %v1336_v42 = vmul.f32 1.442695, %v1209_v14  ;;  %v2063_v23 = vpop.eup %2062  ;;  %v2980_v4 = vpop.f32.mrb[8].mxu0 }
 0x3c7   : > { %1821 = vmatprep.subr.bf16.mxu1 %v1820_v1  ;;  %v1367_v11 = vpop.xlane.xlu0 %1366  ;;  %v2984_v20 = vpop.f32.mrb[9].mxu0  ;;  %v1454_v8 = vmul.f32 %v2063_v23, %v2758_v3  ;;  %v1453_v61 = vmul.f32 %v2063_v23, %v2756_v22 }
 0x3c8   : > { %2072 = vpow2.f32 %v1334_v62  ;;  %1823 = vmatpush1.bf16.xpose.msra.mxu1 %v1822_v6  ;;  %v2993_v32 = vpop.f32.mrb[10].mxu0 }
 0x3c9   : > { %2074 = vpow2.f32 %v1336_v42  ;;  %v2995_v3 = vpop.f32.mrb[11].mxu0 }
 0x3ca   : > { %v2974_v59 = vpop.eup %2064  ;;  %2076 = vrcp.f32 %v1367_v11 }
 0x3cb   : > { %v2978_v0 = vpop.eup %2066  ;;  %v1370_v48 = vpop.xlane.xlu1 %1369 }
 0x3cc   : > { %v2069_v51 = vpop.eup %2068  ;;  %516 = vperm.xlu1 %1929, %v502_v16   ;;  %v1425_v12 = vadd.f32 %v2978_v0, %v2974_v59  ;;  %2078 = vrcp.f32 %v1370_v48 }
 0x3cd   : > { %v1457_v57 = vmul.f32 %v2069_v51, %v2769_v53  ;;  %v1456_v10 = vmul.f32 %v2069_v51, %v2764_v25 }
 0x3ce   : > { %1426 = vadd.xlane.f32.xlu0 %v1425_v12  ;;  %v2071_v53 = vpop.eup %2070 }
 0x3cf   : > { %v1373_v13 = vpop.xlane.xlu0 %1372  ;;  %v1824_v41 = vpack.c.bf16 %v1457_v57, %v1454_v8  ;;  %v1826_v50 = vpack.c.bf16 %v1456_v10, %v1453_v61  ;;  %v1460_v1 = vmul.f32 %v2071_v53, %v2777_v63  ;;  %v1459_v62 = vmul.f32 %v2071_v53, %v2775_v5 }
 0x3d0   : > { %2080 = vrcp.f32 %v1373_v13  ;;  %521 = vperm.xlu1 %1929, %v503_v44  }
 0x3d1   : > { %1825 = vmatprep.subr.bf16.mxu1 %v1824_v41 }
 0x3d2   : > { %v2997_v54 = vpop.eup %2072  ;;  %1827 = vmatpush1.bf16.xpose.msra.mxu1 %v1826_v50 }
 0x3d3   : > { %v2999_v14 = vpop.eup %2074  ;;  %v1376_v22 = vpop.xlane.xlu1 %1375 }
 0x3d4   : > { %v2077_v25 = vpop.eup %2076  ;;  %v1431_v29 = vadd.f32 %v2999_v14, %v2997_v54  ;;  %2082 = vrcp.f32 %v1376_v22 }
 0x3d5   : > { %v1463_v6 = vmul.f32 %v2077_v25, %v2788_v15  ;;  %v1462_v42 = vmul.f32 %v2077_v25, %v2783_v31  ;;  %v501_v25 = vld [vmem:[%s3139_s6 + $0x8] sm:$0xff] }
 0x3d6   : > { %1432 = vadd.xlane.f32.xlu0 %v1431_v29  ;;  %v2079_v48 = vpop.eup %2078 }
 0x3d7   : > { %v1379_v11 = vpop.xlane.xlu0 %1378  ;;  %v1828_v23 = vpack.c.bf16 %v1463_v6, %v1460_v1  ;;  %v1830_v16 = vpack.c.bf16 %v1462_v42, %v1459_v62  ;;  %v1466_v8 = vmul.f32 %v2079_v48, %v2796_v27  ;;  %v1465_v5 = vmul.f32 %v2079_v48, %v2794_v26 }
 0x3d8   : > { %2084 = vrcp.f32 %v1379_v11 }
 0x3d9   : > { %1829 = vmatprep.subr.bf16.mxu1 %v1828_v23 }
 0x3da   : > { %v2081_v51 = vpop.eup %2080  ;;  %1831 = vmatpush1.bf16.xpose.msra.mxu1 %v1830_v16 }
 0x3db   : > { %v1382_v12 = vpop.xlane.xlu1 %1381  ;;  %v1469_v63 = vmul.f32 %v2081_v51, %v2804_v21  ;;  %v1468_v15 = vmul.f32 %v2081_v51, %v2802_v37 }
 0x3dc   : > { %2086 = vrcp.f32 %v1382_v12 }
 0x3dd   : > { %v1832_v31 = vpack.c.bf16 %v1469_v63, %v1466_v8  ;;  %v1834_v57 = vpack.c.bf16 %v1468_v15, %v1465_v5 }
 0x3de   : > { %v2083_v61 = vpop.eup %2082 }
 0x3df   : > { %v1385_v44 = vpop.xlane.xlu0 %1384  ;;  %1833 = vmatprep.subr.bf16.mxu1 %v1832_v31  ;;  %v1472_v41 = vmul.f32 %v2083_v61, %v2812_v24  ;;  %v1471_v37 = vmul.f32 %v2083_v61, %v2810_v40 }
 0x3e0   : > { %2088 = vrcp.f32 %v1385_v44 }
 0x3e2   : > { %v2085_v10 = vpop.eup %2084  ;;  %1835 = vmatpush1.bf16.xpose.msra.mxu1 %v1834_v57 }
 0x3e3   : > { %v1388_v13 = vpop.xlane.xlu1 %1387  ;;  %v1475_v27 = vmul.f32 %v2085_v10, %v2820_v28  ;;  %v1474_v21 = vmul.f32 %v2085_v10, %v2818_v43 }
 0x3e4   : > { %2090 = vrcp.f32 %v1388_v13 }
 0x3e5   : > { %v1836_v50 = vpack.c.bf16 %v1475_v27, %v1472_v41  ;;  %v1838_v26 = vpack.c.bf16 %v1474_v21, %v1471_v37  ;;  %v3219_v41 = vld [vmem:[#allocation10_spill] sm:$0xff]  ;;  %v3220_v27 = vld [vmem:[#allocation9_spill] sm:$0xff] }
 0x3e6   : > { %v2087_v22 = vpop.eup %2086 }
 0x3e7   : > { %v1391_v53 = vpop.xlane.xlu0 %1390  ;;  %1837 = vmatprep.subr.bf16.mxu1 %v1836_v50  ;;  %v1478_v28 = vmul.f32 %v2087_v22, %v2828_v35  ;;  %v1477_v1 = vmul.f32 %v2087_v22, %v2826_v46  ;;  %v3221_v22 = vld [vmem:[#allocation12_spill] sm:$0xff] }
 0x3e8   : > { %2092 = vrcp.f32 %v1391_v53 }
 0x3ea   : > { %v2089_v29 = vpop.eup %2088  ;;  %1839 = vmatpush1.bf16.xpose.msra.mxu1 %v1838_v26 }
 0x3eb   : > { %v1394_v24 = vpop.xlane.xlu1 %1393  ;;  %v1481_v43 = vmul.f32 %v2089_v29, %v2836_v33  ;;  %v1480_v40 = vmul.f32 %v2089_v29, %v2834_v49  ;;  %v3222_v29 = vld [vmem:[#allocation11_spill] sm:$0xff] }
 0x3ec   : > { %511 = vperm.xlu0 %1928, %v501_v25   ;;  %2094 = vrcp.f32 %v1394_v24 }
 0x3ed   : > { %v1840_v6 = vpack.c.bf16 %v1481_v43, %v1478_v28  ;;  %v1842_v62 = vpack.c.bf16 %v1480_v40, %v1477_v1 }
 0x3ee   : > { %v2091_v11 = vpop.eup %2090 }
 0x3ef   : > { %v1397_v42 = vpop.xlane.xlu0 %1396  ;;  %1841 = vmatprep.subr.bf16.mxu1 %v1840_v6  ;;  %v1484_v48 = vmul.f32 %v2091_v11, %v2844_v18  ;;  %v1483_v49 = vmul.f32 %v2091_v11, %v2842_v52  ;;  %v3223_v11 = vld [vmem:[#allocation15_spill] sm:$0xff] }
 0x3f0   : > { %2096 = vrcp.f32 %v1397_v42 }
 0x3f2   : > { %v2093_v23 = vpop.eup %2092  ;;  %1843 = vmatpush1.bf16.xpose.msra.mxu1 %v1842_v62 }
 0x3f3   : > { %v1400_v16 = vpop.xlane.xlu1 %1399  ;;  %v1487_v35 = vmul.f32 %v2093_v23, %v2852_v30  ;;  %v1486_v33 = vmul.f32 %v2093_v23, %v2850_v55 }
 0x3f4   : > { %2098 = vrcp.f32 %v1400_v16  ;;  %v3224_v16 = vld [vmem:[#allocation14_spill] sm:$0xff] }
 0x3f5   : > { %v1844_v51 = vpack.c.bf16 %v1487_v35, %v1484_v48  ;;  %v1846_v46 = vpack.c.bf16 %v1486_v33, %v1483_v49  ;;  %v3225_v48 = vld [vmem:[#allocation13_spill] sm:$0xff] }
 0x3f6   : > { %v2095_v8 = vpop.eup %2094 }
 0x3f7   : > { %v1403_v12 = vpop.xlane.xlu0 %1402  ;;  %1845 = vmatprep.subr.bf16.mxu1 %v1844_v51  ;;  %v1490_v5 = vmul.f32 %v2095_v8, %v2860_v34  ;;  %v1489_v55 = vmul.f32 %v2095_v8, %v2858_v58 }
 0x3f8   : > { %2100 = vrcp.f32 %v1403_v12  ;;  %v3226_v12 = vld [vmem:[#allocation20_spill] sm:$0xff] }
 0x3fa   : > { %v2097_v63 = vpop.eup %2096  ;;  %1847 = vmatpush1.bf16.xpose.msra.mxu1 %v1846_v46 }
 0x3fb   : > { %v1406_v15 = vpop.xlane.xlu1 %1405  ;;  %v1493_v18 = vmul.f32 %v2097_v63, %v2868_v60  ;;  %v1492_v30 = vmul.f32 %v2097_v63, %v2866_v2 }
 0x3fc   : > { %2102 = vrcp.f32 %v1406_v15  ;;  %v3227_v15 = vld [vmem:[#allocation17_spill] sm:$0xff] }
 0x3fd   : > { %v1848_v31 = vpack.c.bf16 %v1493_v18, %v1490_v5  ;;  %v1850_v52 = vpack.c.bf16 %v1492_v30, %v1489_v55  ;;  %v3228_v5 = vld [vmem:[#allocation19_spill] sm:$0xff]  ;;  %v3229_v30 = vld [vmem:[#allocation18_spill] sm:$0xff] }
 0x3fe   : > { %v2099_v44 = vpop.eup %2098 }
 0x3ff   : > { %v1409_v57 = vpop.xlane.xlu0 %1408  ;;  %1849 = vmatprep.subr.bf16.mxu1 %v1848_v31  ;;  %v1496_v13 = vmul.f32 %v2099_v44, %v2876_v39  ;;  %v1495_v2 = vmul.f32 %v2099_v44, %v3220_v27  ;;  %v3230_v31 = vld [vmem:[#allocation16_spill] sm:$0xff] }
 0x400   : > { %2104 = vrcp.f32 %v1409_v57 }
 0x402   : > { %v2101_v61 = vpop.eup %2100  ;;  %1851 = vmatpush1.bf16.xpose.msra.mxu1 %v1850_v52 }
 0x403   : > { %v1412_v10 = vpop.xlane.xlu1 %1411  ;;  %v1499_v34 = vmul.f32 %v2101_v61, %v2884_v47  ;;  %v1498_v60 = vmul.f32 %v2101_v61, %v3219_v41  ;;  %v3231_v41 = vld [vmem:[#allocation23_spill] sm:$0xff] }
 0x404   : > { %2106 = vrcp.f32 %v1412_v10 }
 0x405   : > { %v1852_v21 = vpack.c.bf16 %v1499_v34, %v1496_v13  ;;  %v1854_v58 = vpack.c.bf16 %v1498_v60, %v1495_v2  ;;  %v3232_v2 = vld [vmem:[#allocation22_spill] sm:$0xff] }
 0x406   : > { %v2103_v50 = vpop.eup %2102 }
 0x407   : > { %v1415_v37 = vpop.xlane.xlu0 %1414  ;;  %1853 = vmatprep.subr.bf16.mxu1 %v1852_v21  ;;  %v1502_v25 = vmul.f32 %v2103_v50, %v3221_v22  ;;  %v1501_v24 = vmul.f32 %v2103_v50, %v3222_v29 }
 0x408   : > { %2108 = vrcp.f32 %v1415_v37 }
 0x40a   : > { %v2105_v26 = vpop.eup %2104  ;;  %1855 = vmatpush1.bf16.xpose.msra.mxu1 %v1854_v58 }
 0x40b   : > { %v1418_v53 = vpop.xlane.xlu1 %1417  ;;  %v1505_v39 = vmul.f32 %v2105_v26, %v2900_v45  ;;  %v1504_v47 = vmul.f32 %v2105_v26, %v2898_v36 }
 0x40c   : > { %2110 = vrcp.f32 %v1418_v53 }
 0x40d   : > { %v1856_v28 = vpack.c.bf16 %v1505_v39, %v1502_v25  ;;  %v1858_v43 = vpack.c.bf16 %v1504_v47, %v1501_v24 }
 0x40e   : > { %v2107_v1 = vpop.eup %2106 }
 0x40f   : > { %v1421_v40 = vpop.xlane.xlu0 %1420  ;;  %1857 = vmatprep.subr.bf16.mxu1 %v1856_v28  ;;  %v1508_v42 = vmul.f32 %v2107_v1, %v2908_v7  ;;  %v1507_v36 = vmul.f32 %v2107_v1, %v3225_v48 }
 0x410   : > { %2112 = vrcp.f32 %v1421_v40  ;;  %v1620_v40 = vstv %s1619_s27 }
 0x412   : > { %v2109_v6 = vpop.eup %2108  ;;  %1859 = vmatpush1.bf16.xpose.msra.mxu1 %v1858_v43 }
 0x413   : > { %v1424_v62 = vpop.xlane.xlu1 %1423  ;;  %v1511_v23 = vmul.f32 %v2109_v6, %v3223_v11  ;;  %v1510_v45 = vmul.f32 %v2109_v6, %v3224_v16  ;;  %v2123_v11 = vld [vmem:[%s2394_s20 + $0x8] sm:$0xff] }
 0x414   : > { %2114 = vrcp.f32 %v1424_v62  ;;  %v2122_v62 = vld [vmem:[%s2394_s20] sm:$0xff] }
 0x415   : > { %v1860_v35 = vpack.c.bf16 %v1511_v23, %v1508_v42  ;;  %v1862_v33 = vpack.c.bf16 %v1510_v45, %v1507_v36  ;;  %v2124_v45 = vld [vmem:[%s2394_s20 + $0x10] sm:$0xff]  ;;  %v2125_v36 = vld [vmem:[%s2394_s20 + $0x18] sm:$0xff] }
 0x416   : > { %v2111_v51 = vpop.eup %2110 }
 0x417   : > { %1861 = vmatprep.subr.bf16.mxu1 %v1860_v35  ;;  %v507_v49 = vpop.permute.xlu1 %506  ;;  %v1514_v7 = vmul.f32 %v2111_v51, %v3227_v15  ;;  %v1513_v52 = vmul.f32 %v2111_v51, %v3230_v31 }
 0x418   : > { %v603_v46 = vadd.f32 %v2943_v9, %v507_v49  ;;  %v605_v8 = vadd.f32 %v3226_v12, %v507_v49  ;;  %v2126_v12 = vld [vmem:[%s2394_s20 + $0x20] sm:$0xff] }
 0x41a   : > { %v2113_v63 = vpop.eup %2112  ;;  %1863 = vmatpush1.bf16.xpose.msra.mxu1 %v1862_v33  ;;  %1594 = vmatprep.mubr.f32.mxu1 %v605_v8 }
 0x41b   : > { %v1517_v18 = vmul.f32 %v2113_v63, %v3228_v5  ;;  %v1516_v55 = vmul.f32 %v2113_v63, %v3229_v30  ;;  %v2127_v63 = vld [vmem:[%s2394_s20 + $0x28] sm:$0xff] }
 0x41d   : > { %v1864_v57 = vpack.c.bf16 %v1517_v18, %v1514_v7  ;;  %v1866_v44 = vpack.c.bf16 %v1516_v55, %v1513_v52  ;;  %v2128_v55 = vld [vmem:[%s2394_s20 + $0x30] sm:$0xff]  ;;  %v2129_v52 = vld [vmem:[%s2394_s20 + $0x38] sm:$0xff] }
 0x41e   : > { %v2115_v13 = vpop.eup %2114 }
 0x41f   : > { %1865 = vmatprep.subr.bf16.mxu1 %v1864_v57  ;;  %v1520_v60 = vmul.f32 %v2115_v13, %v3231_v41  ;;  %v1519_v21 = vmul.f32 %v2115_v13, %v3232_v2 }
 0x422   : > { %1867 = vmatpush1.bf16.xpose.msra.mxu1 %v1866_v44 }
 0x448   : > { %v1430_v9 = vpop.xlane.xlu1 %1429 }
 0x45b   : > { %v1427_v61 = vpop.xlane.xlu0 %1426 }
 0x45c   : > { %2116 = vrcp.f32 %v1427_v61 }
 0x45d   : > { %2118 = vrcp.f32 %v1430_v9 }
 0x463   : > { %v1433_v10 = vpop.xlane.xlu0 %1432 }
 0x464   : > { %2120 = vrcp.f32 %v1433_v10 }
 0x466   : > { %v2117_v34 = vpop.eup %2116 }
 0x467   : > { %v1523_v27 = vmul.f32 %v2117_v34, %v2978_v0  ;;  %v1522_v58 = vmul.f32 %v2117_v34, %v2974_v59  ;;  %v2119_v26 = vpop.eup %2118  ;;  %v517_v59 = vpop.permute.xlu1 %516 }
 0x468   : > { %v1526_v22 = vmul.f32 %v2119_v26, %v2953_v17  ;;  %v1525_v39 = vmul.f32 %v2119_v26, %v2951_v38  ;;  %v617_v17 = vadd.f32 %v2984_v20, %v517_v59  ;;  %v615_v38 = vadd.f32 %v2980_v4, %v517_v59 }
 0x469   : > { %v1868_v37 = vpack.c.bf16 %v1523_v27, %v1520_v60  ;;  %v1870_v50 = vpack.c.bf16 %v1522_v58, %v1519_v21 }
 0x46b   : > { %1869 = vmatprep.subr.bf16.mxu1 %v1868_v37  ;;  %v512_v24 = vpop.permute.xlu0 %511 }
 0x46c   : > { %1871 = vmatpush1.bf16.xpose.msra.mxu1 %v1870_v50  ;;  %v611_v28 = vadd.f32 %v2976_v56, %v512_v24  ;;  %v609_v43 = vadd.f32 %v2972_v19, %v512_v24 }
 0x46e   : > { %v2121_v53 = vpop.eup %2120 }
 0x46f   : > { %v1529_v25 = vmul.f32 %v2121_v53, %v2999_v14  ;;  %v1528_v47 = vmul.f32 %v2121_v53, %v2997_v54  ;;  %v522_v14 = vpop.permute.xlu1 %521 }
 0x470   : > { %v623_v54 = vadd.f32 %v2995_v3, %v522_v14  ;;  %v621_v56 = vadd.f32 %v2993_v32, %v522_v14 }
 0x471   : > { %v1872_v29 = vpack.c.bf16 %v1529_v25, %v1526_v22  ;;  %v1874_v0 = vpack.c.bf16 %v1528_v47, %v1525_v39 }
 0x473   : > { %1873 = vmatprep.subr.bf16.mxu1 %v1872_v29 }
 0x474   : > { %1875 = vmatpush1.bf16.xpose.msra.mxu1 %v1874_v0 }
 0x47b   : > { %1595 = vmatmul.mubr.f32.vlgmr.msra.gmra.mrb[64].mxu1 %v603_v46 }
 0x47c   : > { %1600 = vmatprep.mubr.f32.mxu1 %v611_v28 }
 0x47f   : > { %1601 = vmatmul.mubr.f32.gmra.mrb[66].mxu1 %v609_v43 }
 0x480   : > { %1606 = vmatprep.mubr.f32.mxu1 %v617_v17 }
 0x483   : > { %1607 = vmatmul.mubr.f32.gmra.mrb[68].mxu1 %v615_v38 }
 0x484   : > { %1612 = vmatprep.mubr.f32.mxu1 %v623_v54 }
 0x487   : > { %1613 = vmatmul.mubr.f32.gmra.mrb[70].mxu1 %v621_v56 }
 0x54e   : > { %v1596_v19 = vpop.f32.mrb[64].mxu1 }
 0x54f   : > { %v1621_v20 = vmul.f32 %v1620_v40, %v1596_v19  ;;  %v1598_v1 = vpop.f32.mrb[65].mxu1 }
 0x550   : > { %v1622_v6 = vmul.f32 %v1620_v40, %v1598_v1 }
 0x551   : > { %v1629_v42 = vadd.f32 %v2122_v62, %v1621_v20 }
 0x552   : > { %v1630_v4 = vadd.f32 %v2123_v11, %v1622_v6  ;;  %v1602_v23 = vpop.f32.mrb[66].mxu1 }
 0x553   : > { %1637 = vst [vmem:[%s3066_s28] sm:$0xff] %v1629_v42  ;;  %v1623_v32 = vmul.f32 %v1620_v40, %v1602_v23  ;;  %v1604_v3 = vpop.f32.mrb[67].mxu1 }
 0x554   : > { %1638 = vst [vmem:[%s3066_s28 + $0x8] sm:$0xff] %v1630_v4  ;;  %v1624_v16 = vmul.f32 %v1620_v40, %v1604_v3 }
 0x555   : > { %v1631_v48 = vadd.f32 %v2124_v45, %v1623_v32 }
 0x556   : > { %v1632_v35 = vadd.f32 %v2125_v36, %v1624_v16  ;;  %v1608_v33 = vpop.f32.mrb[68].mxu1 }
 0x557   : > { %1639 = vst [vmem:[%s3066_s28 + $0x10] sm:$0xff] %v1631_v48  ;;  %v1625_v49 = vmul.f32 %v1620_v40, %v1608_v33  ;;  %v1610_v51 = vpop.f32.mrb[69].mxu1 }
 0x558   : > { %1640 = vst [vmem:[%s3066_s28 + $0x18] sm:$0xff] %v1632_v35  ;;  %v1626_v46 = vmul.f32 %v1620_v40, %v1610_v51 }
 0x559   : > { %v1633_v8 = vadd.f32 %v2126_v12, %v1625_v49 }
 0x55a   : > { %v1634_v15 = vadd.f32 %v2127_v63, %v1626_v46  ;;  %v1614_v7 = vpop.f32.mrb[70].mxu1 }
 0x55b   : > { %1641 = vst [vmem:[%s3066_s28 + $0x20] sm:$0xff] %v1633_v8  ;;  %v1627_v5 = vmul.f32 %v1620_v40, %v1614_v7  ;;  %v1616_v18 = vpop.f32.mrb[71].mxu1 }
 0x55c   : > { %1642 = vst [vmem:[%s3066_s28 + $0x28] sm:$0xff] %v1634_v15  ;;  %v1628_v30 = vmul.f32 %v1620_v40, %v1616_v18 }
 0x55d   : > { %v1635_v31 = vadd.f32 %v2128_v55, %v1627_v5 }
 0x55e   : > { %v1636_v57 = vadd.f32 %v2129_v52, %v1628_v30 }
 0x55f   : > { %1643 = vst [vmem:[%s3066_s28 + $0x30] sm:$0xff] %v1635_v31 }
 0x560   : > { %1644 = vst [vmem:[%s3066_s28 + $0x38] sm:$0xff] %v1636_v57 }
 0x561   : > { %2173 = shalt.err (!%p2170_p2)
}
 0x562   : > { %s2174_s20 = scalar_lea.hbm %s3086_s14, 1024  ;;  %s2178_s28 = scalar_lea.hbm %s3141_s8, 2048 }
 0x563   : > { %p2175_p4 = scmp.ne.s32.totalorder %s3086_s14, %s2174_s20  ;;  %p2179_p9 = scmp.lt.u32.totalorder %s3086_s14, %s3141_s8 }
 0x564   : > { %p2180_p1 = scmp.lt.u32.totalorder %s2178_s28, %s2174_s20  ;;  %p2182_p6 = scmp.lt.u32.totalorder %s2174_s20, %s3086_s14 }
 0x565   : > { %p2176_p5 = pnand %p2175_p4, %p3233_p11 }
 0x566   : > { %p2181_p3 = por %p2180_p1, %p2179_p9 }
 0x567   : > { %p2177_p7 = pneg %p2176_p5 }
 0x568   : > { %p2183_p12 = por %p2182_p6, %p2181_p3 }
 0x56a   : > { %p2184_p13 = pnand %p2183_p12, %p2177_p7 }
 0x56c   : > { %2187 = shalt.err (!%p2184_p13)
}
 0x56d   : > { %s2234_s26 = smov 256   ;;  %s2235_s13 = smov 16  }
 0x56e   : > { %1878 = dma.vmem_to_hbm [thread:$0]  (%p3233_p11), %s3079_s22, 1024, %s3086_s14, %s1646_s7, %s2234_s26, %s2234_s26, %s2235_s13  }
 0x56f PF: > { %s1674_s16 = sand.u32 1, %s2214_s29   ;;  %p3234_p8 = scmp.ne.s32.totalorder %s3174_s19, 0 }
 0x570   : > { %p3235_p10 = scmp.ge.s32.totalorder %s2226_s10, 2  ;;  %s1675_s23 = scalar_lea.sflag [#allocation5], %s1674_s16 }
 0x572   : > { %p1885_p0 = pnand %p3235_p10, %p3234_p8 }
 0x574   : > { %2209 = dma.done.wait (!%p1885_p0), %s1675_s23, 1024  }
 0x575   : > { %2211 = vsyncadd (!%p1885_p0), %s1675_s23, 4294966272  ;;  %p22_p2 = scmp.ge.s32.totalorder %s2309_s12, 4   ;;  %s3236_s29 = smov %s2218_s30 }
 0x576   : > { %s3237_s30 = smov %s2222_s9  ;;  %s3238_s9 = smov %s2321_s15 }
 0x577   : > { %s3239_s10 = smov %s2309_s12  ;;  %24 = sbr.rel (!%p22_p2) target bundleno = 7 (0x7), region = 97 }
 0x57e   :  { %1680 = vsyncpa [#allocation4], 1 }
 0x57f   :  { %1682 = vsyncpa [#allocation4 + $0x1], 1 }
 0x580   :  { %1683 = vsyncpa [#allocation5], 1 }
 0x581   :  { %1685 = vsyncpa [#allocation5 + $0x1], 1 }

</bundles_post_ra>
